<compile_context>
chip_gen: v7x
topology: tpu7x:2x2x1
jax: 0.10.0
libtpu: 0.0.40
codegen_flags: <defaults>
</compile_context>

<pallas_src>
import functools

import jax
import jax.numpy as jnp
from jax import lax
from jax.experimental import pallas as pl
from jax.experimental.pallas import tpu as pltpu

# Synthetic, deterministic SDF parameters (the "implicit_fn").
SPHERE_CENTER = (0.1, -0.05, 3.0)   # python floats -> scalar immediates in-kernel
SPHERE_RADIUS = 1.0


def _render_kernel(o_ref, d_ref, w_ref, b_ref, color_ref, *,
                   max_iters, far, sub_rows):
    """One grid step = one chunk of rays (the module's chunked forward loop).

    o_ref/d_ref/color_ref blocks are (3, block_rows, 128): component-major
    SoA, rays on the sublane/lane axes.  w_ref (3,3) and b_ref (3,) are SMEM.
    The block is processed in sub_rows-row sub-tiles to cap vreg pressure.
    """
    block_rows = o_ref.shape[1]
    n_sub = block_rows // sub_rows                 # static
    cx, cy, cz = SPHERE_CENTER                     # scalar immediates

    # Hoist all SMEM scalar reads out of the sub-tile loop.
    w00, w01, w02 = w_ref[0, 0], w_ref[0, 1], w_ref[0, 2]
    w10, w11, w12 = w_ref[1, 0], w_ref[1, 1], w_ref[1, 2]
    w20, w21, w22 = w_ref[2, 0], w_ref[2, 1], w_ref[2, 2]
    bias0, bias1, bias2 = b_ref[0], b_ref[1], b_ref[2]

    @pl.loop(0, n_sub)                             # outer sub-tile loop, not unrolled
    def _(s):
        r0 = pl.multiple_of(s * sub_rows, sub_rows)
        rsel = pl.ds(r0, sub_rows)

        ox, oy, oz = o_ref[0, rsel, :], o_ref[1, rsel, :], o_ref[2, rsel, :]
        dx, dy, dz = d_ref[0, rsel, :], d_ref[1, rsel, :], d_ref[2, rsel, :]

        # Scalar-t parameterization of the march (valid for the baked
        # analytic-sphere SDF): ||o + t*d - c||^2 = a + t*(b_q + t*nd).
        rx, ry, rz = ox - cx, oy - cy, oz - cz
        a = rx * rx + ry * ry + rz * rz            # ||o - c||^2     (SUB,128)
        b_q = 2.0 * (rx * dx + ry * dy + rz * dz)  # 2 (o-c).d
        nd = dx * dx + dy * dy + dz * dz           # ||d||^2

        def body(_, carry):
            t, dmax = carry
            q = jnp.maximum(a + t * (b_q + t * nd), 0.0)
            dist = jnp.sqrt(q) - SPHERE_RADIUS
            t = t + dist
            # mask = AND_i (dist_i < far)  <=>  max_i dist_i < far
            dmax = jnp.maximum(dmax, dist)
            return t, dmax

        t0 = jnp.zeros(a.shape, dtype=jnp.float32)
        dmax0 = jnp.full(a.shape, -jnp.inf, dtype=jnp.float32)
        t, dmax = lax.fori_loop(0, max_iters, body, (t0, dmax0), unroll=True)
        hit = dmax < far                           # (SUB, 128) bool

        # Reconstruct final points; re-read o/d so the march's live set stays
        # small (reloads are cheap vlds in the epilogue).
        ox, oy, oz = o_ref[0, rsel, :], o_ref[1, rsel, :], o_ref[2, rsel, :]
        dx, dy, dz = d_ref[0, rsel, :], d_ref[1, rsel, :], d_ref[2, rsel, :]
        px = ox + t * dx
        py = oy + t * dy
        pz = oz + t * dz

        # Color head: sigmoid(p @ W + b).  K=3 contraction -> VPU, not MXU.
        c0 = jax.nn.sigmoid(px * w00 + py * w10 + pz * w20 + bias0)
        c1 = jax.nn.sigmoid(px * w01 + py * w11 + pz * w21 + bias1)
        c2 = jax.nn.sigmoid(px * w02 + py * w12 + pz * w22 + bias2)

        zero = jnp.zeros_like(c0)
        color_ref[0, rsel, :] = jnp.where(hit, c0, zero)   # color[~mask] = 0
        color_ref[1, rsel, :] = jnp.where(hit, c1, zero)
        color_ref[2, rsel, :] = jnp.where(hit, c2, zero)


def sphere_tracing_render_soa(o_soa, d_soa, w, b, *,
                              chunk_rays=32768, max_iters=32, far=10.0,
                              sub_rows=16):
    """SoA entry point (no wrapper transposes).

    o_soa, d_soa: (3, N) f32.  Returns color (3, N) f32.
    """
    lanes = 128
    assert chunk_rays % (8 * lanes) == 0, "chunk_rays must be a multiple of 8*128"
    block_rows = chunk_rays // lanes
    assert block_rows % sub_rows == 0, "block_rows must be a multiple of sub_rows"

    N = o_soa.shape[1]
    # Pad the ray count so it tiles evenly; padded rays (zero origin/direction)
    # are harmless for the forward pass and sliced off below.
    n_pad = (-N) % chunk_rays
    if n_pad:
        o_soa = jnp.concatenate(
            [o_soa, jnp.zeros((3, n_pad), o_soa.dtype)], axis=1)
        d_soa = jnp.concatenate(
            [d_soa, jnp.zeros((3, n_pad), d_soa.dtype)], axis=1)
    n_total = N + n_pad
    rows = n_total // lanes

    # Contiguous reshape only (no transpose / extra HBM pass).
    o_blk = o_soa.reshape(3, rows, lanes)
    d_blk = d_soa.reshape(3, rows, lanes)

    kernel = functools.partial(_render_kernel, max_iters=int(max_iters),
                               far=float(far), sub_rows=int(sub_rows))
    out = pl.pallas_call(
        kernel,
        out_shape=jax.ShapeDtypeStruct((3, rows, lanes), jnp.float32),
        grid_spec=pltpu.PrefetchScalarGridSpec(
            num_scalar_prefetch=0,
            grid=(rows // block_rows,),
            in_specs=[
                pl.BlockSpec((3, block_rows, lanes), lambda i: (0, i, 0)),  # origins
                pl.BlockSpec((3, block_rows, lanes), lambda i: (0, i, 0)),  # directions
                pl.BlockSpec(memory_space=pltpu.MemorySpace.SMEM),          # W (3,3)
                pl.BlockSpec(memory_space=pltpu.MemorySpace.SMEM),          # b (3,)
            ],
            out_specs=pl.BlockSpec((3, block_rows, lanes), lambda i: (0, i, 0)),
        ),
        compiler_params=pltpu.CompilerParams(
            dimension_semantics=("parallel",)),   # independent chunks -> v7x 2 TCs
    )(o_blk, d_blk, w, b.reshape(3))

    return out.reshape(3, n_total)[:, :N]


def sphere_tracing_render(origins, directions, w, b, **kwargs):
    """AoS compatibility wrapper matching the module interface.

    origins/directions: (N, 3).  Returns color (N, 3).
    Prefer `sphere_tracing_render_soa` to avoid the extra transpose passes.
    """
    color_soa = sphere_tracing_render_soa(origins.T, directions.T, w, b, **kwargs)
    return color_soa.T


def _reference(origins, directions, w, b, *, max_iters, far):
    """Pure-JAX mirror of SphereTracingRenderer.forward semantics (AoS)."""
    center = jnp.array(SPHERE_CENTER, dtype=jnp.float32)
    pts = origins
    msk = jnp.ones((origins.shape[0], 1), dtype=bool)
    for _ in range(max_iters):
        d = jnp.linalg.norm(pts - center, axis=-1, keepdims=True) - SPHERE_RADIUS
        pts = pts + directions * d
        msk = jnp.logical_and(msk, d < far)
    col = jax.nn.sigmoid(pts @ w + b.reshape(1, 3))
    return jnp.where(msk, col, 0.0)


if __name__ == "__main__":
    # cfg: near=0.0 (unused in forward), far=10.0, max_iters=32.
    # chunk_rays plays the role of cfg.chunk_size (rays per grid step).
    far, max_iters = 10.0, 32
    chunk_rays = 4096            # block_rows = 32 (small demo); default is 32768
    N_RAYS = 16384               # -> grid of 4 chunks (>= 2 per v7x core)

    key = jax.random.PRNGKey(0)
    k_o, k_d, k_w, k_b = jax.random.split(key, 4)

    # Rays are generated directly in SoA (3, N) layout -> no wrapper transpose.
    o_soa = 0.2 * jax.random.normal(k_o, (3, N_RAYS), dtype=jnp.float32)
    d_raw = jax.random.normal(k_d, (3, N_RAYS), dtype=jnp.float32) \
        + jnp.array([[0.0], [0.0], [2.0]], dtype=jnp.float32)
    d_soa = d_raw / jnp.linalg.norm(d_raw, axis=0, keepdims=True)

    # Deterministic synthetic color-head parameters (implicit_fn.get_color).
    w = 0.5 * jax.random.normal(k_w, (3, 3), dtype=jnp.float32)
    b = 0.1 * jax.random.normal(k_b, (3,), dtype=jnp.float32)

    color = sphere_tracing_render_soa(
        o_soa, d_soa, w, b,
        chunk_rays=chunk_rays, max_iters=max_iters, far=far, sub_rows=16)
    color = jax.block_until_ready(color)

    ref = _reference(o_soa.T, d_soa.T, w, b, max_iters=max_iters, far=far)
    assert color.shape == (3, N_RAYS)
    assert jnp.allclose(color.T, ref, atol=1e-4, rtol=1e-4), "mismatch vs reference"

    print("KERNEL_OK")
</pallas_src>

<mosaic_0001>
module attributes {stable_mosaic.version = 11 : i64} {
  func.func @_render_kernel(%arg0: i32, %arg1: memref<3x32x128xf32, #tpu.memory_space<vmem>>, %arg2: memref<3x32x128xf32, #tpu.memory_space<vmem>>, %arg3: memref<3x3xf32, #tpu.memory_space<smem>>, %arg4: memref<3xf32, #tpu.memory_space<smem>>, %arg5: memref<3x32x128xf32, #tpu.memory_space<vmem>>) attributes {dimension_semantics = [#tpu.dimension_semantics<parallel>], iteration_bounds = array<i64: 4>, scalar_prefetch = 0 : i64, scratch_operands = 0 : i64, tpu.core_type = #tpu.core_type<tc>, window_params = [{transform_indices = @transform_0, window_bounds = array<i64: 3, 32, 128>}, {transform_indices = @transform_1, window_bounds = array<i64: 3, 32, 128>}, {transform_indices = @transform_2, window_bounds = array<i64: 3, 3>}, {transform_indices = @transform_3, window_bounds = array<i64: 3>}, {transform_indices = @transform_4, window_bounds = array<i64: 3, 32, 128>}]} {
    %c0 = arith.constant 0 : index
    %c0_0 = arith.constant 0 : index
    %0 = memref.load %arg3[%c0, %c0_0] : memref<3x3xf32, #tpu.memory_space<smem>>
    %c0_1 = arith.constant 0 : index
    %c1 = arith.constant 1 : index
    %1 = memref.load %arg3[%c0_1, %c1] : memref<3x3xf32, #tpu.memory_space<smem>>
    %c0_2 = arith.constant 0 : index
    %c2 = arith.constant 2 : index
    %2 = memref.load %arg3[%c0_2, %c2] : memref<3x3xf32, #tpu.memory_space<smem>>
    %c1_3 = arith.constant 1 : index
    %c0_4 = arith.constant 0 : index
    %3 = memref.load %arg3[%c1_3, %c0_4] : memref<3x3xf32, #tpu.memory_space<smem>>
    %c1_5 = arith.constant 1 : index
    %c1_6 = arith.constant 1 : index
    %4 = memref.load %arg3[%c1_5, %c1_6] : memref<3x3xf32, #tpu.memory_space<smem>>
    %c1_7 = arith.constant 1 : index
    %c2_8 = arith.constant 2 : index
    %5 = memref.load %arg3[%c1_7, %c2_8] : memref<3x3xf32, #tpu.memory_space<smem>>
    %c2_9 = arith.constant 2 : index
    %c0_10 = arith.constant 0 : index
    %6 = memref.load %arg3[%c2_9, %c0_10] : memref<3x3xf32, #tpu.memory_space<smem>>
    %c2_11 = arith.constant 2 : index
    %c1_12 = arith.constant 1 : index
    %7 = memref.load %arg3[%c2_11, %c1_12] : memref<3x3xf32, #tpu.memory_space<smem>>
    %c2_13 = arith.constant 2 : index
    %c2_14 = arith.constant 2 : index
    %8 = memref.load %arg3[%c2_13, %c2_14] : memref<3x3xf32, #tpu.memory_space<smem>>
    %c0_15 = arith.constant 0 : index
    %9 = memref.load %arg4[%c0_15] : memref<3xf32, #tpu.memory_space<smem>>
    %c1_16 = arith.constant 1 : index
    %10 = memref.load %arg4[%c1_16] : memref<3xf32, #tpu.memory_space<smem>>
    %c2_17 = arith.constant 2 : index
    %11 = memref.load %arg4[%c2_17] : memref<3xf32, #tpu.memory_space<smem>>
    %c0_i32 = arith.constant 0 : i32
    %c2_i32 = arith.constant 2 : i32
    %12 = arith.addi %c0_i32, %c2_i32 : i32
    %c1_i32 = arith.constant 1 : i32
    scf.for %arg6 = %c0_i32 to %12 step %c1_i32  : i32 {
      %c1_i32_19 = arith.constant 1 : i32
      %13 = arith.muli %arg6, %c1_i32_19 : i32
      %c0_i32_20 = arith.constant 0 : i32
      %14 = arith.addi %c0_i32_20, %13 : i32
      %c16_i32 = arith.constant 16 : i32
      %15 = arith.muli %14, %c16_i32 : i32
      %16 = tpu.assume_multiple %15, 16 : i32
      %c0_21 = arith.constant 0 : index
      %17 = arith.index_cast %16 : i32 to index
      %c0_22 = arith.constant 0 : index
      %18 = vector.load %arg1[%c0_21, %17, %c0_22] : memref<3x32x128xf32, #tpu.memory_space<vmem>>, vector<1x16x128xf32>
      %19 = vector.shape_cast %18 : vector<1x16x128xf32> to vector<16x128xf32>
      %c1_23 = arith.constant 1 : index
      %20 = arith.index_cast %16 : i32 to index
      %c0_24 = arith.constant 0 : index
      %21 = vector.load %arg1[%c1_23, %20, %c0_24] : memref<3x32x128xf32, #tpu.memory_space<vmem>>, vector<1x16x128xf32>
      %22 = vector.shape_cast %21 : vector<1x16x128xf32> to vector<16x128xf32>
      %c2_25 = arith.constant 2 : index
      %23 = arith.index_cast %16 : i32 to index
      %c0_26 = arith.constant 0 : index
      %24 = vector.load %arg1[%c2_25, %23, %c0_26] : memref<3x32x128xf32, #tpu.memory_space<vmem>>, vector<1x16x128xf32>
      %25 = vector.shape_cast %24 : vector<1x16x128xf32> to vector<16x128xf32>
      %c0_27 = arith.constant 0 : index
      %26 = arith.index_cast %16 : i32 to index
      %c0_28 = arith.constant 0 : index
      %27 = vector.load %arg2[%c0_27, %26, %c0_28] : memref<3x32x128xf32, #tpu.memory_space<vmem>>, vector<1x16x128xf32>
      %28 = vector.shape_cast %27 : vector<1x16x128xf32> to vector<16x128xf32>
      %c1_29 = arith.constant 1 : index
      %29 = arith.index_cast %16 : i32 to index
      %c0_30 = arith.constant 0 : index
      %30 = vector.load %arg2[%c1_29, %29, %c0_30] : memref<3x32x128xf32, #tpu.memory_space<vmem>>, vector<1x16x128xf32>
      %31 = vector.shape_cast %30 : vector<1x16x128xf32> to vector<16x128xf32>
      %c2_31 = arith.constant 2 : index
      %32 = arith.index_cast %16 : i32 to index
      %c0_32 = arith.constant 0 : index
      %33 = vector.load %arg2[%c2_31, %32, %c0_32] : memref<3x32x128xf32, #tpu.memory_space<vmem>>, vector<1x16x128xf32>
      %34 = vector.shape_cast %33 : vector<1x16x128xf32> to vector<16x128xf32>
      %cst = arith.constant 1.000000e-01 : f32
      %35 = vector.broadcast %cst : f32 to vector<16x128xf32>
      %36 = arith.subf %19, %35 : vector<16x128xf32>
      %cst_33 = arith.constant -5.000000e-02 : f32
      %37 = vector.broadcast %cst_33 : f32 to vector<16x128xf32>
      %38 = arith.subf %22, %37 : vector<16x128xf32>
      %cst_34 = arith.constant 3.000000e+00 : f32
      %39 = vector.broadcast %cst_34 : f32 to vector<16x128xf32>
      %40 = arith.subf %25, %39 : vector<16x128xf32>
      %41 = arith.mulf %36, %36 : vector<16x128xf32>
      %42 = arith.mulf %38, %38 : vector<16x128xf32>
      %43 = arith.addf %41, %42 : vector<16x128xf32>
      %44 = arith.mulf %40, %40 : vector<16x128xf32>
      %45 = arith.addf %43, %44 : vector<16x128xf32>
      %46 = arith.mulf %36, %28 : vector<16x128xf32>
      %47 = arith.mulf %38, %31 : vector<16x128xf32>
      %48 = arith.addf %46, %47 : vector<16x128xf32>
      %49 = arith.mulf %40, %34 : vector<16x128xf32>
      %50 = arith.addf %48, %49 : vector<16x128xf32>
      %cst_35 = arith.constant 2.000000e+00 : f32
      %51 = vector.broadcast %cst_35 : f32 to vector<16x128xf32>
      %52 = arith.mulf %51, %50 : vector<16x128xf32>
      %53 = arith.mulf %28, %28 : vector<16x128xf32>
      %54 = arith.mulf %31, %31 : vector<16x128xf32>
      %55 = arith.addf %53, %54 : vector<16x128xf32>
      %56 = arith.mulf %34, %34 : vector<16x128xf32>
      %57 = arith.addf %55, %56 : vector<16x128xf32>
      %cst_36 = arith.constant 0.000000e+00 : f32
      %58 = vector.broadcast %cst_36 : f32 to vector<16x128xf32>
      %cst_37 = arith.constant 0xFF800000 : f32
      %59 = vector.broadcast %cst_37 : f32 to vector<16x128xf32>
      %c0_i32_38 = arith.constant 0 : i32
      %60 = arith.mulf %58, %57 : vector<16x128xf32>
      %61 = arith.addf %52, %60 : vector<16x128xf32>
      %62 = arith.mulf %58, %61 : vector<16x128xf32>
      %63 = arith.addf %45, %62 : vector<16x128xf32>
      %cst_39 = arith.constant 0.000000e+00 : f32
      %64 = vector.broadcast %cst_39 : f32 to vector<16x128xf32>
      %65 = arith.maximumf %63, %64 : vector<16x128xf32>
      %66 = math.sqrt %65 : vector<16x128xf32>
      %cst_40 = arith.constant 1.000000e+00 : f32
      %67 = vector.broadcast %cst_40 : f32 to vector<16x128xf32>
      %68 = arith.subf %66, %67 : vector<16x128xf32>
      %69 = arith.addf %58, %68 : vector<16x128xf32>
      %70 = arith.maximumf %59, %68 : vector<16x128xf32>
      %c1_i32_41 = arith.constant 1 : i32
      %71 = arith.mulf %69, %57 : vector<16x128xf32>
      %72 = arith.addf %52, %71 : vector<16x128xf32>
      %73 = arith.mulf %69, %72 : vector<16x128xf32>
      %74 = arith.addf %45, %73 : vector<16x128xf32>
      %cst_42 = arith.constant 0.000000e+00 : f32
      %75 = vector.broadcast %cst_42 : f32 to vector<16x128xf32>
      %76 = arith.maximumf %74, %75 : vector<16x128xf32>
      %77 = math.sqrt %76 : vector<16x128xf32>
      %cst_43 = arith.constant 1.000000e+00 : f32
      %78 = vector.broadcast %cst_43 : f32 to vector<16x128xf32>
      %79 = arith.subf %77, %78 : vector<16x128xf32>
      %80 = arith.addf %69, %79 : vector<16x128xf32>
      %81 = arith.maximumf %70, %79 : vector<16x128xf32>
      %c2_i32_44 = arith.constant 2 : i32
      %82 = arith.mulf %80, %57 : vector<16x128xf32>
      %83 = arith.addf %52, %82 : vector<16x128xf32>
      %84 = arith.mulf %80, %83 : vector<16x128xf32>
      %85 = arith.addf %45, %84 : vector<16x128xf32>
      %cst_45 = arith.constant 0.000000e+00 : f32
      %86 = vector.broadcast %cst_45 : f32 to vector<16x128xf32>
      %87 = arith.maximumf %85, %86 : vector<16x128xf32>
      %88 = math.sqrt %87 : vector<16x128xf32>
      %cst_46 = arith.constant 1.000000e+00 : f32
      %89 = vector.broadcast %cst_46 : f32 to vector<16x128xf32>
      %90 = arith.subf %88, %89 : vector<16x128xf32>
      %91 = arith.addf %80, %90 : vector<16x128xf32>
      %92 = arith.maximumf %81, %90 : vector<16x128xf32>
      %c3_i32 = arith.constant 3 : i32
      %93 = arith.mulf %91, %57 : vector<16x128xf32>
      %94 = arith.addf %52, %93 : vector<16x128xf32>
      %95 = arith.mulf %91, %94 : vector<16x128xf32>
      %96 = arith.addf %45, %95 : vector<16x128xf32>
      %cst_47 = arith.constant 0.000000e+00 : f32
      %97 = vector.broadcast %cst_47 : f32 to vector<16x128xf32>
      %98 = arith.maximumf %96, %97 : vector<16x128xf32>
      %99 = math.sqrt %98 : vector<16x128xf32>
      %cst_48 = arith.constant 1.000000e+00 : f32
      %100 = vector.broadcast %cst_48 : f32 to vector<16x128xf32>
      %101 = arith.subf %99, %100 : vector<16x128xf32>
      %102 = arith.addf %91, %101 : vector<16x128xf32>
      %103 = arith.maximumf %92, %101 : vector<16x128xf32>
      %c4_i32 = arith.constant 4 : i32
      %104 = arith.mulf %102, %57 : vector<16x128xf32>
      %105 = arith.addf %52, %104 : vector<16x128xf32>
      %106 = arith.mulf %102, %105 : vector<16x128xf32>
      %107 = arith.addf %45, %106 : vector<16x128xf32>
      %cst_49 = arith.constant 0.000000e+00 : f32
      %108 = vector.broadcast %cst_49 : f32 to vector<16x128xf32>
      %109 = arith.maximumf %107, %108 : vector<16x128xf32>
      %110 = math.sqrt %109 : vector<16x128xf32>
      %cst_50 = arith.constant 1.000000e+00 : f32
      %111 = vector.broadcast %cst_50 : f32 to vector<16x128xf32>
      %112 = arith.subf %110, %111 : vector<16x128xf32>
      %113 = arith.addf %102, %112 : vector<16x128xf32>
      %114 = arith.maximumf %103, %112 : vector<16x128xf32>
      %c5_i32 = arith.constant 5 : i32
      %115 = arith.mulf %113, %57 : vector<16x128xf32>
      %116 = arith.addf %52, %115 : vector<16x128xf32>
      %117 = arith.mulf %113, %116 : vector<16x128xf32>
      %118 = arith.addf %45, %117 : vector<16x128xf32>
      %cst_51 = arith.constant 0.000000e+00 : f32
      %119 = vector.broadcast %cst_51 : f32 to vector<16x128xf32>
      %120 = arith.maximumf %118, %119 : vector<16x128xf32>
      %121 = math.sqrt %120 : vector<16x128xf32>
      %cst_52 = arith.constant 1.000000e+00 : f32
      %122 = vector.broadcast %cst_52 : f32 to vector<16x128xf32>
      %123 = arith.subf %121, %122 : vector<16x128xf32>
      %124 = arith.addf %113, %123 : vector<16x128xf32>
      %125 = arith.maximumf %114, %123 : vector<16x128xf32>
      %c6_i32 = arith.constant 6 : i32
      %126 = arith.mulf %124, %57 : vector<16x128xf32>
      %127 = arith.addf %52, %126 : vector<16x128xf32>
      %128 = arith.mulf %124, %127 : vector<16x128xf32>
      %129 = arith.addf %45, %128 : vector<16x128xf32>
      %cst_53 = arith.constant 0.000000e+00 : f32
      %130 = vector.broadcast %cst_53 : f32 to vector<16x128xf32>
      %131 = arith.maximumf %129, %130 : vector<16x128xf32>
      %132 = math.sqrt %131 : vector<16x128xf32>
      %cst_54 = arith.constant 1.000000e+00 : f32
      %133 = vector.broadcast %cst_54 : f32 to vector<16x128xf32>
      %134 = arith.subf %132, %133 : vector<16x128xf32>
      %135 = arith.addf %124, %134 : vector<16x128xf32>
      %136 = arith.maximumf %125, %134 : vector<16x128xf32>
      %c7_i32 = arith.constant 7 : i32
      %137 = arith.mulf %135, %57 : vector<16x128xf32>
      %138 = arith.addf %52, %137 : vector<16x128xf32>
      %139 = arith.mulf %135, %138 : vector<16x128xf32>
      %140 = arith.addf %45, %139 : vector<16x128xf32>
      %cst_55 = arith.constant 0.000000e+00 : f32
      %141 = vector.broadcast %cst_55 : f32 to vector<16x128xf32>
      %142 = arith.maximumf %140, %141 : vector<16x128xf32>
      %143 = math.sqrt %142 : vector<16x128xf32>
      %cst_56 = arith.constant 1.000000e+00 : f32
      %144 = vector.broadcast %cst_56 : f32 to vector<16x128xf32>
      %145 = arith.subf %143, %144 : vector<16x128xf32>
      %146 = arith.addf %135, %145 : vector<16x128xf32>
      %147 = arith.maximumf %136, %145 : vector<16x128xf32>
      %c8_i32 = arith.constant 8 : i32
      %148 = arith.mulf %146, %57 : vector<16x128xf32>
      %149 = arith.addf %52, %148 : vector<16x128xf32>
      %150 = arith.mulf %146, %149 : vector<16x128xf32>
      %151 = arith.addf %45, %150 : vector<16x128xf32>
      %cst_57 = arith.constant 0.000000e+00 : f32
      %152 = vector.broadcast %cst_57 : f32 to vector<16x128xf32>
      %153 = arith.maximumf %151, %152 : vector<16x128xf32>
      %154 = math.sqrt %153 : vector<16x128xf32>
      %cst_58 = arith.constant 1.000000e+00 : f32
      %155 = vector.broadcast %cst_58 : f32 to vector<16x128xf32>
      %156 = arith.subf %154, %155 : vector<16x128xf32>
      %157 = arith.addf %146, %156 : vector<16x128xf32>
      %158 = arith.maximumf %147, %156 : vector<16x128xf32>
      %c9_i32 = arith.constant 9 : i32
      %159 = arith.mulf %157, %57 : vector<16x128xf32>
      %160 = arith.addf %52, %159 : vector<16x128xf32>
      %161 = arith.mulf %157, %160 : vector<16x128xf32>
      %162 = arith.addf %45, %161 : vector<16x128xf32>
      %cst_59 = arith.constant 0.000000e+00 : f32
      %163 = vector.broadcast %cst_59 : f32 to vector<16x128xf32>
      %164 = arith.maximumf %162, %163 : vector<16x128xf32>
      %165 = math.sqrt %164 : vector<16x128xf32>
      %cst_60 = arith.constant 1.000000e+00 : f32
      %166 = vector.broadcast %cst_60 : f32 to vector<16x128xf32>
      %167 = arith.subf %165, %166 : vector<16x128xf32>
      %168 = arith.addf %157, %167 : vector<16x128xf32>
      %169 = arith.maximumf %158, %167 : vector<16x128xf32>
      %c10_i32 = arith.constant 10 : i32
      %170 = arith.mulf %168, %57 : vector<16x128xf32>
      %171 = arith.addf %52, %170 : vector<16x128xf32>
      %172 = arith.mulf %168, %171 : vector<16x128xf32>
      %173 = arith.addf %45, %172 : vector<16x128xf32>
      %cst_61 = arith.constant 0.000000e+00 : f32
      %174 = vector.broadcast %cst_61 : f32 to vector<16x128xf32>
      %175 = arith.maximumf %173, %174 : vector<16x128xf32>
      %176 = math.sqrt %175 : vector<16x128xf32>
      %cst_62 = arith.constant 1.000000e+00 : f32
      %177 = vector.broadcast %cst_62 : f32 to vector<16x128xf32>
      %178 = arith.subf %176, %177 : vector<16x128xf32>
      %179 = arith.addf %168, %178 : vector<16x128xf32>
      %180 = arith.maximumf %169, %178 : vector<16x128xf32>
      %c11_i32 = arith.constant 11 : i32
      %181 = arith.mulf %179, %57 : vector<16x128xf32>
      %182 = arith.addf %52, %181 : vector<16x128xf32>
      %183 = arith.mulf %179, %182 : vector<16x128xf32>
      %184 = arith.addf %45, %183 : vector<16x128xf32>
      %cst_63 = arith.constant 0.000000e+00 : f32
      %185 = vector.broadcast %cst_63 : f32 to vector<16x128xf32>
      %186 = arith.maximumf %184, %185 : vector<16x128xf32>
      %187 = math.sqrt %186 : vector<16x128xf32>
      %cst_64 = arith.constant 1.000000e+00 : f32
      %188 = vector.broadcast %cst_64 : f32 to vector<16x128xf32>
      %189 = arith.subf %187, %188 : vector<16x128xf32>
      %190 = arith.addf %179, %189 : vector<16x128xf32>
      %191 = arith.maximumf %180, %189 : vector<16x128xf32>
      %c12_i32 = arith.constant 12 : i32
      %192 = arith.mulf %190, %57 : vector<16x128xf32>
      %193 = arith.addf %52, %192 : vector<16x128xf32>
      %194 = arith.mulf %190, %193 : vector<16x128xf32>
      %195 = arith.addf %45, %194 : vector<16x128xf32>
      %cst_65 = arith.constant 0.000000e+00 : f32
      %196 = vector.broadcast %cst_65 : f32 to vector<16x128xf32>
      %197 = arith.maximumf %195, %196 : vector<16x128xf32>
      %198 = math.sqrt %197 : vector<16x128xf32>
      %cst_66 = arith.constant 1.000000e+00 : f32
      %199 = vector.broadcast %cst_66 : f32 to vector<16x128xf32>
      %200 = arith.subf %198, %199 : vector<16x128xf32>
      %201 = arith.addf %190, %200 : vector<16x128xf32>
      %202 = arith.maximumf %191, %200 : vector<16x128xf32>
      %c13_i32 = arith.constant 13 : i32
      %203 = arith.mulf %201, %57 : vector<16x128xf32>
      %204 = arith.addf %52, %203 : vector<16x128xf32>
      %205 = arith.mulf %201, %204 : vector<16x128xf32>
      %206 = arith.addf %45, %205 : vector<16x128xf32>
      %cst_67 = arith.constant 0.000000e+00 : f32
      %207 = vector.broadcast %cst_67 : f32 to vector<16x128xf32>
      %208 = arith.maximumf %206, %207 : vector<16x128xf32>
      %209 = math.sqrt %208 : vector<16x128xf32>
      %cst_68 = arith.constant 1.000000e+00 : f32
      %210 = vector.broadcast %cst_68 : f32 to vector<16x128xf32>
      %211 = arith.subf %209, %210 : vector<16x128xf32>
      %212 = arith.addf %201, %211 : vector<16x128xf32>
      %213 = arith.maximumf %202, %211 : vector<16x128xf32>
      %c14_i32 = arith.constant 14 : i32
      %214 = arith.mulf %212, %57 : vector<16x128xf32>
      %215 = arith.addf %52, %214 : vector<16x128xf32>
      %216 = arith.mulf %212, %215 : vector<16x128xf32>
      %217 = arith.addf %45, %216 : vector<16x128xf32>
      %cst_69 = arith.constant 0.000000e+00 : f32
      %218 = vector.broadcast %cst_69 : f32 to vector<16x128xf32>
      %219 = arith.maximumf %217, %218 : vector<16x128xf32>
      %220 = math.sqrt %219 : vector<16x128xf32>
      %cst_70 = arith.constant 1.000000e+00 : f32
      %221 = vector.broadcast %cst_70 : f32 to vector<16x128xf32>
      %222 = arith.subf %220, %221 : vector<16x128xf32>
      %223 = arith.addf %212, %222 : vector<16x128xf32>
      %224 = arith.maximumf %213, %222 : vector<16x128xf32>
      %c15_i32 = arith.constant 15 : i32
      %225 = arith.mulf %223, %57 : vector<16x128xf32>
      %226 = arith.addf %52, %225 : vector<16x128xf32>
      %227 = arith.mulf %223, %226 : vector<16x128xf32>
      %228 = arith.addf %45, %227 : vector<16x128xf32>
      %cst_71 = arith.constant 0.000000e+00 : f32
      %229 = vector.broadcast %cst_71 : f32 to vector<16x128xf32>
      %230 = arith.maximumf %228, %229 : vector<16x128xf32>
      %231 = math.sqrt %230 : vector<16x128xf32>
      %cst_72 = arith.constant 1.000000e+00 : f32
      %232 = vector.broadcast %cst_72 : f32 to vector<16x128xf32>
      %233 = arith.subf %231, %232 : vector<16x128xf32>
      %234 = arith.addf %223, %233 : vector<16x128xf32>
      %235 = arith.maximumf %224, %233 : vector<16x128xf32>
      %c16_i32_73 = arith.constant 16 : i32
      %236 = arith.mulf %234, %57 : vector<16x128xf32>
      %237 = arith.addf %52, %236 : vector<16x128xf32>
      %238 = arith.mulf %234, %237 : vector<16x128xf32>
      %239 = arith.addf %45, %238 : vector<16x128xf32>
      %cst_74 = arith.constant 0.000000e+00 : f32
      %240 = vector.broadcast %cst_74 : f32 to vector<16x128xf32>
      %241 = arith.maximumf %239, %240 : vector<16x128xf32>
      %242 = math.sqrt %241 : vector<16x128xf32>
      %cst_75 = arith.constant 1.000000e+00 : f32
      %243 = vector.broadcast %cst_75 : f32 to vector<16x128xf32>
      %244 = arith.subf %242, %243 : vector<16x128xf32>
      %245 = arith.addf %234, %244 : vector<16x128xf32>
      %246 = arith.maximumf %235, %244 : vector<16x128xf32>
      %c17_i32 = arith.constant 17 : i32
      %247 = arith.mulf %245, %57 : vector<16x128xf32>
      %248 = arith.addf %52, %247 : vector<16x128xf32>
      %249 = arith.mulf %245, %248 : vector<16x128xf32>
      %250 = arith.addf %45, %249 : vector<16x128xf32>
      %cst_76 = arith.constant 0.000000e+00 : f32
      %251 = vector.broadcast %cst_76 : f32 to vector<16x128xf32>
      %252 = arith.maximumf %250, %251 : vector<16x128xf32>
      %253 = math.sqrt %252 : vector<16x128xf32>
      %cst_77 = arith.constant 1.000000e+00 : f32
      %254 = vector.broadcast %cst_77 : f32 to vector<16x128xf32>
      %255 = arith.subf %253, %254 : vector<16x128xf32>
      %256 = arith.addf %245, %255 : vector<16x128xf32>
      %257 = arith.maximumf %246, %255 : vector<16x128xf32>
      %c18_i32 = arith.constant 18 : i32
      %258 = arith.mulf %256, %57 : vector<16x128xf32>
      %259 = arith.addf %52, %258 : vector<16x128xf32>
      %260 = arith.mulf %256, %259 : vector<16x128xf32>
      %261 = arith.addf %45, %260 : vector<16x128xf32>
      %cst_78 = arith.constant 0.000000e+00 : f32
      %262 = vector.broadcast %cst_78 : f32 to vector<16x128xf32>
      %263 = arith.maximumf %261, %262 : vector<16x128xf32>
      %264 = math.sqrt %263 : vector<16x128xf32>
      %cst_79 = arith.constant 1.000000e+00 : f32
      %265 = vector.broadcast %cst_79 : f32 to vector<16x128xf32>
      %266 = arith.subf %264, %265 : vector<16x128xf32>
      %267 = arith.addf %256, %266 : vector<16x128xf32>
      %268 = arith.maximumf %257, %266 : vector<16x128xf32>
      %c19_i32 = arith.constant 19 : i32
      %269 = arith.mulf %267, %57 : vector<16x128xf32>
      %270 = arith.addf %52, %269 : vector<16x128xf32>
      %271 = arith.mulf %267, %270 : vector<16x128xf32>
      %272 = arith.addf %45, %271 : vector<16x128xf32>
      %cst_80 = arith.constant 0.000000e+00 : f32
      %273 = vector.broadcast %cst_80 : f32 to vector<16x128xf32>
      %274 = arith.maximumf %272, %273 : vector<16x128xf32>
      %275 = math.sqrt %274 : vector<16x128xf32>
      %cst_81 = arith.constant 1.000000e+00 : f32
      %276 = vector.broadcast %cst_81 : f32 to vector<16x128xf32>
      %277 = arith.subf %275, %276 : vector<16x128xf32>
      %278 = arith.addf %267, %277 : vector<16x128xf32>
      %279 = arith.maximumf %268, %277 : vector<16x128xf32>
      %c20_i32 = arith.constant 20 : i32
      %280 = arith.mulf %278, %57 : vector<16x128xf32>
      %281 = arith.addf %52, %280 : vector<16x128xf32>
      %282 = arith.mulf %278, %281 : vector<16x128xf32>
      %283 = arith.addf %45, %282 : vector<16x128xf32>
      %cst_82 = arith.constant 0.000000e+00 : f32
      %284 = vector.broadcast %cst_82 : f32 to vector<16x128xf32>
      %285 = arith.maximumf %283, %284 : vector<16x128xf32>
      %286 = math.sqrt %285 : vector<16x128xf32>
      %cst_83 = arith.constant 1.000000e+00 : f32
      %287 = vector.broadcast %cst_83 : f32 to vector<16x128xf32>
      %288 = arith.subf %286, %287 : vector<16x128xf32>
      %289 = arith.addf %278, %288 : vector<16x128xf32>
      %290 = arith.maximumf %279, %288 : vector<16x128xf32>
      %c21_i32 = arith.constant 21 : i32
      %291 = arith.mulf %289, %57 : vector<16x128xf32>
      %292 = arith.addf %52, %291 : vector<16x128xf32>
      %293 = arith.mulf %289, %292 : vector<16x128xf32>
      %294 = arith.addf %45, %293 : vector<16x128xf32>
      %cst_84 = arith.constant 0.000000e+00 : f32
      %295 = vector.broadcast %cst_84 : f32 to vector<16x128xf32>
      %296 = arith.maximumf %294, %295 : vector<16x128xf32>
      %297 = math.sqrt %296 : vector<16x128xf32>
      %cst_85 = arith.constant 1.000000e+00 : f32
      %298 = vector.broadcast %cst_85 : f32 to vector<16x128xf32>
      %299 = arith.subf %297, %298 : vector<16x128xf32>
      %300 = arith.addf %289, %299 : vector<16x128xf32>
      %301 = arith.maximumf %290, %299 : vector<16x128xf32>
      %c22_i32 = arith.constant 22 : i32
      %302 = arith.mulf %300, %57 : vector<16x128xf32>
      %303 = arith.addf %52, %302 : vector<16x128xf32>
      %304 = arith.mulf %300, %303 : vector<16x128xf32>
      %305 = arith.addf %45, %304 : vector<16x128xf32>
      %cst_86 = arith.constant 0.000000e+00 : f32
      %306 = vector.broadcast %cst_86 : f32 to vector<16x128xf32>
      %307 = arith.maximumf %305, %306 : vector<16x128xf32>
      %308 = math.sqrt %307 : vector<16x128xf32>
      %cst_87 = arith.constant 1.000000e+00 : f32
      %309 = vector.broadcast %cst_87 : f32 to vector<16x128xf32>
      %310 = arith.subf %308, %309 : vector<16x128xf32>
      %311 = arith.addf %300, %310 : vector<16x128xf32>
      %312 = arith.maximumf %301, %310 : vector<16x128xf32>
      %c23_i32 = arith.constant 23 : i32
      %313 = arith.mulf %311, %57 : vector<16x128xf32>
      %314 = arith.addf %52, %313 : vector<16x128xf32>
      %315 = arith.mulf %311, %314 : vector<16x128xf32>
      %316 = arith.addf %45, %315 : vector<16x128xf32>
      %cst_88 = arith.constant 0.000000e+00 : f32
      %317 = vector.broadcast %cst_88 : f32 to vector<16x128xf32>
      %318 = arith.maximumf %316, %317 : vector<16x128xf32>
      %319 = math.sqrt %318 : vector<16x128xf32>
      %cst_89 = arith.constant 1.000000e+00 : f32
      %320 = vector.broadcast %cst_89 : f32 to vector<16x128xf32>
      %321 = arith.subf %319, %320 : vector<16x128xf32>
      %322 = arith.addf %311, %321 : vector<16x128xf32>
      %323 = arith.maximumf %312, %321 : vector<16x128xf32>
      %c24_i32 = arith.constant 24 : i32
      %324 = arith.mulf %322, %57 : vector<16x128xf32>
      %325 = arith.addf %52, %324 : vector<16x128xf32>
      %326 = arith.mulf %322, %325 : vector<16x128xf32>
      %327 = arith.addf %45, %326 : vector<16x128xf32>
      %cst_90 = arith.constant 0.000000e+00 : f32
      %328 = vector.broadcast %cst_90 : f32 to vector<16x128xf32>
      %329 = arith.maximumf %327, %328 : vector<16x128xf32>
      %330 = math.sqrt %329 : vector<16x128xf32>
      %cst_91 = arith.constant 1.000000e+00 : f32
      %331 = vector.broadcast %cst_91 : f32 to vector<16x128xf32>
      %332 = arith.subf %330, %331 : vector<16x128xf32>
      %333 = arith.addf %322, %332 : vector<16x128xf32>
      %334 = arith.maximumf %323, %332 : vector<16x128xf32>
      %c25_i32 = arith.constant 25 : i32
      %335 = arith.mulf %333, %57 : vector<16x128xf32>
      %336 = arith.addf %52, %335 : vector<16x128xf32>
      %337 = arith.mulf %333, %336 : vector<16x128xf32>
      %338 = arith.addf %45, %337 : vector<16x128xf32>
      %cst_92 = arith.constant 0.000000e+00 : f32
      %339 = vector.broadcast %cst_92 : f32 to vector<16x128xf32>
      %340 = arith.maximumf %338, %339 : vector<16x128xf32>
      %341 = math.sqrt %340 : vector<16x128xf32>
      %cst_93 = arith.constant 1.000000e+00 : f32
      %342 = vector.broadcast %cst_93 : f32 to vector<16x128xf32>
      %343 = arith.subf %341, %342 : vector<16x128xf32>
      %344 = arith.addf %333, %343 : vector<16x128xf32>
      %345 = arith.maximumf %334, %343 : vector<16x128xf32>
      %c26_i32 = arith.constant 26 : i32
      %346 = arith.mulf %344, %57 : vector<16x128xf32>
      %347 = arith.addf %52, %346 : vector<16x128xf32>
      %348 = arith.mulf %344, %347 : vector<16x128xf32>
      %349 = arith.addf %45, %348 : vector<16x128xf32>
      %cst_94 = arith.constant 0.000000e+00 : f32
      %350 = vector.broadcast %cst_94 : f32 to vector<16x128xf32>
      %351 = arith.maximumf %349, %350 : vector<16x128xf32>
      %352 = math.sqrt %351 : vector<16x128xf32>
      %cst_95 = arith.constant 1.000000e+00 : f32
      %353 = vector.broadcast %cst_95 : f32 to vector<16x128xf32>
      %354 = arith.subf %352, %353 : vector<16x128xf32>
      %355 = arith.addf %344, %354 : vector<16x128xf32>
      %356 = arith.maximumf %345, %354 : vector<16x128xf32>
      %c27_i32 = arith.constant 27 : i32
      %357 = arith.mulf %355, %57 : vector<16x128xf32>
      %358 = arith.addf %52, %357 : vector<16x128xf32>
      %359 = arith.mulf %355, %358 : vector<16x128xf32>
      %360 = arith.addf %45, %359 : vector<16x128xf32>
      %cst_96 = arith.constant 0.000000e+00 : f32
      %361 = vector.broadcast %cst_96 : f32 to vector<16x128xf32>
      %362 = arith.maximumf %360, %361 : vector<16x128xf32>
      %363 = math.sqrt %362 : vector<16x128xf32>
      %cst_97 = arith.constant 1.000000e+00 : f32
      %364 = vector.broadcast %cst_97 : f32 to vector<16x128xf32>
      %365 = arith.subf %363, %364 : vector<16x128xf32>
      %366 = arith.addf %355, %365 : vector<16x128xf32>
      %367 = arith.maximumf %356, %365 : vector<16x128xf32>
      %c28_i32 = arith.constant 28 : i32
      %368 = arith.mulf %366, %57 : vector<16x128xf32>
      %369 = arith.addf %52, %368 : vector<16x128xf32>
      %370 = arith.mulf %366, %369 : vector<16x128xf32>
      %371 = arith.addf %45, %370 : vector<16x128xf32>
      %cst_98 = arith.constant 0.000000e+00 : f32
      %372 = vector.broadcast %cst_98 : f32 to vector<16x128xf32>
      %373 = arith.maximumf %371, %372 : vector<16x128xf32>
      %374 = math.sqrt %373 : vector<16x128xf32>
      %cst_99 = arith.constant 1.000000e+00 : f32
      %375 = vector.broadcast %cst_99 : f32 to vector<16x128xf32>
      %376 = arith.subf %374, %375 : vector<16x128xf32>
      %377 = arith.addf %366, %376 : vector<16x128xf32>
      %378 = arith.maximumf %367, %376 : vector<16x128xf32>
      %c29_i32 = arith.constant 29 : i32
      %379 = arith.mulf %377, %57 : vector<16x128xf32>
      %380 = arith.addf %52, %379 : vector<16x128xf32>
      %381 = arith.mulf %377, %380 : vector<16x128xf32>
      %382 = arith.addf %45, %381 : vector<16x128xf32>
      %cst_100 = arith.constant 0.000000e+00 : f32
      %383 = vector.broadcast %cst_100 : f32 to vector<16x128xf32>
      %384 = arith.maximumf %382, %383 : vector<16x128xf32>
      %385 = math.sqrt %384 : vector<16x128xf32>
      %cst_101 = arith.constant 1.000000e+00 : f32
      %386 = vector.broadcast %cst_101 : f32 to vector<16x128xf32>
      %387 = arith.subf %385, %386 : vector<16x128xf32>
      %388 = arith.addf %377, %387 : vector<16x128xf32>
      %389 = arith.maximumf %378, %387 : vector<16x128xf32>
      %c30_i32 = arith.constant 30 : i32
      %390 = arith.mulf %388, %57 : vector<16x128xf32>
      %391 = arith.addf %52, %390 : vector<16x128xf32>
      %392 = arith.mulf %388, %391 : vector<16x128xf32>
      %393 = arith.addf %45, %392 : vector<16x128xf32>
      %cst_102 = arith.constant 0.000000e+00 : f32
      %394 = vector.broadcast %cst_102 : f32 to vector<16x128xf32>
      %395 = arith.maximumf %393, %394 : vector<16x128xf32>
      %396 = math.sqrt %395 : vector<16x128xf32>
      %cst_103 = arith.constant 1.000000e+00 : f32
      %397 = vector.broadcast %cst_103 : f32 to vector<16x128xf32>
      %398 = arith.subf %396, %397 : vector<16x128xf32>
      %399 = arith.addf %388, %398 : vector<16x128xf32>
      %400 = arith.maximumf %389, %398 : vector<16x128xf32>
      %c31_i32 = arith.constant 31 : i32
      %401 = arith.mulf %399, %57 : vector<16x128xf32>
      %402 = arith.addf %52, %401 : vector<16x128xf32>
      %403 = arith.mulf %399, %402 : vector<16x128xf32>
      %404 = arith.addf %45, %403 : vector<16x128xf32>
      %cst_104 = arith.constant 0.000000e+00 : f32
      %405 = vector.broadcast %cst_104 : f32 to vector<16x128xf32>
      %406 = arith.maximumf %404, %405 : vector<16x128xf32>
      %407 = math.sqrt %406 : vector<16x128xf32>
      %cst_105 = arith.constant 1.000000e+00 : f32
      %408 = vector.broadcast %cst_105 : f32 to vector<16x128xf32>
      %409 = arith.subf %407, %408 : vector<16x128xf32>
      %410 = arith.addf %399, %409 : vector<16x128xf32>
      %411 = arith.maximumf %400, %409 : vector<16x128xf32>
      %cst_106 = arith.constant 1.000000e+01 : f32
      %412 = vector.broadcast %cst_106 : f32 to vector<16x128xf32>
      %413 = arith.cmpf olt, %411, %412 : vector<16x128xf32>
      %c0_107 = arith.constant 0 : index
      %414 = arith.index_cast %16 : i32 to index
      %c0_108 = arith.constant 0 : index
      %415 = vector.load %arg1[%c0_107, %414, %c0_108] : memref<3x32x128xf32, #tpu.memory_space<vmem>>, vector<1x16x128xf32>
      %416 = vector.shape_cast %415 : vector<1x16x128xf32> to vector<16x128xf32>
      %c1_109 = arith.constant 1 : index
      %417 = arith.index_cast %16 : i32 to index
      %c0_110 = arith.constant 0 : index
      %418 = vector.load %arg1[%c1_109, %417, %c0_110] : memref<3x32x128xf32, #tpu.memory_space<vmem>>, vector<1x16x128xf32>
      %419 = vector.shape_cast %418 : vector<1x16x128xf32> to vector<16x128xf32>
      %c2_111 = arith.constant 2 : index
      %420 = arith.index_cast %16 : i32 to index
      %c0_112 = arith.constant 0 : index
      %421 = vector.load %arg1[%c2_111, %420, %c0_112] : memref<3x32x128xf32, #tpu.memory_space<vmem>>, vector<1x16x128xf32>
      %422 = vector.shape_cast %421 : vector<1x16x128xf32> to vector<16x128xf32>
      %c0_113 = arith.constant 0 : index
      %423 = arith.index_cast %16 : i32 to index
      %c0_114 = arith.constant 0 : index
      %424 = vector.load %arg2[%c0_113, %423, %c0_114] : memref<3x32x128xf32, #tpu.memory_space<vmem>>, vector<1x16x128xf32>
      %425 = vector.shape_cast %424 : vector<1x16x128xf32> to vector<16x128xf32>
      %c1_115 = arith.constant 1 : index
      %426 = arith.index_cast %16 : i32 to index
      %c0_116 = arith.constant 0 : index
      %427 = vector.load %arg2[%c1_115, %426, %c0_116] : memref<3x32x128xf32, #tpu.memory_space<vmem>>, vector<1x16x128xf32>
      %428 = vector.shape_cast %427 : vector<1x16x128xf32> to vector<16x128xf32>
      %c2_117 = arith.constant 2 : index
      %429 = arith.index_cast %16 : i32 to index
      %c0_118 = arith.constant 0 : index
      %430 = vector.load %arg2[%c2_117, %429, %c0_118] : memref<3x32x128xf32, #tpu.memory_space<vmem>>, vector<1x16x128xf32>
      %431 = vector.shape_cast %430 : vector<1x16x128xf32> to vector<16x128xf32>
      %432 = arith.mulf %410, %425 : vector<16x128xf32>
      %433 = arith.addf %416, %432 : vector<16x128xf32>
      %434 = arith.mulf %410, %428 : vector<16x128xf32>
      %435 = arith.addf %419, %434 : vector<16x128xf32>
      %436 = arith.mulf %410, %431 : vector<16x128xf32>
      %437 = arith.addf %422, %436 : vector<16x128xf32>
      %438 = vector.broadcast %0 : f32 to vector<16x128xf32>
      %439 = arith.mulf %433, %438 : vector<16x128xf32>
      %440 = vector.broadcast %3 : f32 to vector<16x128xf32>
      %441 = arith.mulf %435, %440 : vector<16x128xf32>
      %442 = arith.addf %439, %441 : vector<16x128xf32>
      %443 = vector.broadcast %6 : f32 to vector<16x128xf32>
      %444 = arith.mulf %437, %443 : vector<16x128xf32>
      %445 = arith.addf %442, %444 : vector<16x128xf32>
      %446 = vector.broadcast %9 : f32 to vector<16x128xf32>
      %447 = arith.addf %445, %446 : vector<16x128xf32>
      %448 = arith.negf %447 : vector<16x128xf32>
      %449 = math.exp %448 : vector<16x128xf32>
      %cst_119 = arith.constant 1.000000e+00 : f32
      %450 = vector.broadcast %cst_119 : f32 to vector<16x128xf32>
      %451 = arith.addf %450, %449 : vector<16x128xf32>
      %452 = arith.divf %450, %451 : vector<16x128xf32>
      %453 = vector.broadcast %1 : f32 to vector<16x128xf32>
      %454 = arith.mulf %433, %453 : vector<16x128xf32>
      %455 = vector.broadcast %4 : f32 to vector<16x128xf32>
      %456 = arith.mulf %435, %455 : vector<16x128xf32>
      %457 = arith.addf %454, %456 : vector<16x128xf32>
      %458 = vector.broadcast %7 : f32 to vector<16x128xf32>
      %459 = arith.mulf %437, %458 : vector<16x128xf32>
      %460 = arith.addf %457, %459 : vector<16x128xf32>
      %461 = vector.broadcast %10 : f32 to vector<16x128xf32>
      %462 = arith.addf %460, %461 : vector<16x128xf32>
      %463 = arith.negf %462 : vector<16x128xf32>
      %464 = math.exp %463 : vector<16x128xf32>
      %cst_120 = arith.constant 1.000000e+00 : f32
      %465 = vector.broadcast %cst_120 : f32 to vector<16x128xf32>
      %466 = arith.addf %465, %464 : vector<16x128xf32>
      %467 = arith.divf %465, %466 : vector<16x128xf32>
      %468 = vector.broadcast %2 : f32 to vector<16x128xf32>
      %469 = arith.mulf %433, %468 : vector<16x128xf32>
      %470 = vector.broadcast %5 : f32 to vector<16x128xf32>
      %471 = arith.mulf %435, %470 : vector<16x128xf32>
      %472 = arith.addf %469, %471 : vector<16x128xf32>
      %473 = vector.broadcast %8 : f32 to vector<16x128xf32>
      %474 = arith.mulf %437, %473 : vector<16x128xf32>
      %475 = arith.addf %472, %474 : vector<16x128xf32>
      %476 = vector.broadcast %11 : f32 to vector<16x128xf32>
      %477 = arith.addf %475, %476 : vector<16x128xf32>
      %478 = arith.negf %477 : vector<16x128xf32>
      %479 = math.exp %478 : vector<16x128xf32>
      %cst_121 = arith.constant 1.000000e+00 : f32
      %480 = vector.broadcast %cst_121 : f32 to vector<16x128xf32>
      %481 = arith.addf %480, %479 : vector<16x128xf32>
      %482 = arith.divf %480, %481 : vector<16x128xf32>
      %cst_122 = arith.constant 0.000000e+00 : f32
      %483 = vector.broadcast %cst_122 : f32 to vector<16x128xf32>
      %484 = arith.select %413, %452, %483 : vector<16x128xi1>, vector<16x128xf32>
      %c0_123 = arith.constant 0 : index
      %485 = arith.index_cast %16 : i32 to index
      %c0_124 = arith.constant 0 : index
      %486 = vector.load %arg5[%c0_123, %485, %c0_124] : memref<3x32x128xf32, #tpu.memory_space<vmem>>, vector<1x16x128xf32>
      %487 = vector.shape_cast %486 : vector<1x16x128xf32> to vector<16x128xf32>
      %488 = vector.shape_cast %484 : vector<16x128xf32> to vector<1x16x128xf32>
      tpu.vector_store %arg5[%c0_123, %485, %c0_124], %488 {strides = array<i32>} : memref<3x32x128xf32, #tpu.memory_space<vmem>>, vector<1x16x128xf32>,
      %489 = arith.select %413, %467, %483 : vector<16x128xi1>, vector<16x128xf32>
      %c1_125 = arith.constant 1 : index
      %490 = arith.index_cast %16 : i32 to index
      %c0_126 = arith.constant 0 : index
      %491 = vector.load %arg5[%c1_125, %490, %c0_126] : memref<3x32x128xf32, #tpu.memory_space<vmem>>, vector<1x16x128xf32>
      %492 = vector.shape_cast %491 : vector<1x16x128xf32> to vector<16x128xf32>
      %493 = vector.shape_cast %489 : vector<16x128xf32> to vector<1x16x128xf32>
      tpu.vector_store %arg5[%c1_125, %490, %c0_126], %493 {strides = array<i32>} : memref<3x32x128xf32, #tpu.memory_space<vmem>>, vector<1x16x128xf32>,
      %494 = arith.select %413, %482, %483 : vector<16x128xi1>, vector<16x128xf32>
      %c2_127 = arith.constant 2 : index
      %495 = arith.index_cast %16 : i32 to index
      %c0_128 = arith.constant 0 : index
      %496 = vector.load %arg5[%c2_127, %495, %c0_128] : memref<3x32x128xf32, #tpu.memory_space<vmem>>, vector<1x16x128xf32>
      %497 = vector.shape_cast %496 : vector<1x16x128xf32> to vector<16x128xf32>
      %498 = vector.shape_cast %494 : vector<16x128xf32> to vector<1x16x128xf32>
      tpu.vector_store %arg5[%c2_127, %495, %c0_128], %498 {strides = array<i32>} : memref<3x32x128xf32, #tpu.memory_space<vmem>>, vector<1x16x128xf32>,
    }
    %c2_i32_18 = arith.constant 2 : i32
    return
  }
  func.func @transform_0(%arg0: i32) -> (i32, i32, i32) {
    %c0_i32 = arith.constant 0 : i32
    %c0_i32_0 = arith.constant 0 : i32
    %c0_i32_1 = arith.constant 0 : i32
    return %c0_i32, %arg0, %c0_i32_0 : i32, i32, i32
  }
  func.func @transform_1(%arg0: i32) -> (i32, i32, i32) {
    %c0_i32 = arith.constant 0 : i32
    %c0_i32_0 = arith.constant 0 : i32
    %c0_i32_1 = arith.constant 0 : i32
    return %c0_i32, %arg0, %c0_i32_0 : i32, i32, i32
  }
  func.func @transform_2(%arg0: i32) -> (i32, i32) {
    %c0_i32 = arith.constant 0 : i32
    %c0_i32_0 = arith.constant 0 : i32
    %c0_i32_1 = arith.constant 0 : i32
    return %c0_i32, %c0_i32_0 : i32, i32
  }
  func.func @transform_3(%arg0: i32) -> i32 {
    %c0_i32 = arith.constant 0 : i32
    %c0_i32_0 = arith.constant 0 : i32
    return %c0_i32 : i32
  }
  func.func @transform_4(%arg0: i32) -> (i32, i32, i32) {
    %c0_i32 = arith.constant 0 : i32
    %c0_i32_0 = arith.constant 0 : i32
    %c0_i32_1 = arith.constant 0 : i32
    return %c0_i32, %arg0, %c0_i32_0 : i32, i32, i32
  }
}

</mosaic_0001>

<bundles_post_ra>
// kernel: tpu_custom_call.1
= control target key start
LH: loop header
LB: loop body
LE: loop exit
PB: predicated region body
PF: predicated region fallthrough
CT: control target
= control target key end

     0   :  { %s2831_s0 = inlined_call_operand.hbm [shape: f32[3,128,128], index: 0, kind: input, shape index: {}]   ;;  %s2832_s1 = inlined_call_operand.hbm [shape: f32[3,128,128], index: 1, kind: input, shape index: {}]   ;;  %s2833_s2 = inlined_call_operand.vmem [shape: f32[3,3], index: 2, kind: input, shape index: {}]   ;;  %s2834_s3 = inlined_call_operand.vmem [shape: f32[3], index: 3, kind: input, shape index: {}]   ;;  %s2835_s4 = inlined_call_operand.hbm [shape: f32[3,128,128], index: 4, kind: output, shape index: {}]  }
   0x1   :  { %2842 = sst [smem:[#allocation27_spill]] %s2831_s0 }
   0x2   :  { %2843 = sst [smem:[#allocation28_spill]] %s2832_s1 }
   0x3   :  { %2844 = sst [smem:[#allocation29_spill]] %s2833_s2 }
   0x4   :  { %2845 = sst [smem:[#allocation30_spill]] %s2834_s3 }
   0x5   :  { %9 = vsyncpa [#allocation3], 0 }
   0x6   :  { %11 = vsyncpa [#allocation3 + $0x1], 0 }
   0x7   :  { %12 = vsyncpa [#allocation7], 0 }
   0x8   :  { %14 = vsyncpa [#allocation7 + $0x1], 0 }
   0x9   :  { %15 = vsyncpa [#allocation5], 0 }
   0xa   :  { %16 = vsyncpa [#allocation10], 0 }
   0xb   :  { %17 = vsyncpa [#allocation4], 0 }
   0xc   :  { %19 = vsyncpa [#allocation4 + $0x1], 0  ;;  %s2216_s15 = smov 0   ;;  %s2218_s16 = smov 0  }
   0xd   :  { %s2220_s17 = smov 0   ;;  %s2222_s18 = smov 0  }
   0xe LB: > { %2846 = sst [smem:[#allocation25_spill]] %s2160_s17  ;;  %s2237_s19 = sadd.s32 4294967295, %s2164_s18   ;;  %s2164_s18 = sphi %s2222_s18, %s2878_s18   ;;  %s2160_s17 = sphi %s2220_s17, %s2875_s17   ;;  %s2156_s16 = sphi %s2218_s16, %s2877_s16   ;;  %s2152_s15 = sphi %s2216_s15, %s2876_s15  }
   0xf   : > { %s1674_s20 = sadd.s32 4294967294, %s2164_s18   ;;  %s2241_s21 = sadd.s32 1, %s2164_s18  }
  0x10   : > { %s32_s22 = sadd.s32 1, %s2160_s17  ;;  %s29_s23 = ssub.s32 %s2164_s18, %s2241_s21 }
  0x11   : > { %p39_p0 = scmp.ne.s32.totalorder %s2160_s17, %s2156_s16  ;;  %p30_p1 = scmp.eq.s32.totalorder %s29_s23, 0 }
  0x12   : > { %p40_p2 = scmp.eq.s32.totalorder %s2164_s18, 0  ;;  %p45_p3 = scmp.ne.s32.totalorder %s2156_s16, %s2152_s15 }
  0x13   : > { %p2837_p4 = scmp.eq.s32.totalorder %s2237_s19, 0  ;;  %p137_p7 = scmp.eq.s32.totalorder %s2237_s19, 3 }
  0x14   : > { %s2253_s24 = scalar_select %p30_p1, %s2160_s17, %s32_s22  }
  0x15   : > { %p2255_p5 = por %p40_p2, %p39_p0  ;;  %p2261_p6 = por %p2837_p4, %p45_p3 }
  0x16   : > { %2847 = sst [smem:[#allocation26_spill]] %s2253_s24  ;;  %p143_p8 = scmp.eq.s32.totalorder %s1674_s20, 3 }
  0x17   : > { %s2848_s25 = scalar_select %p2255_p5, 1, 0 }
  0x18   : > { %s2849_s26 = scalar_select %p2261_p6, 1, 0 }
  0x19   : > { %p1675_p9 = scmp.ge.s32.totalorder %s2164_s18, 1  ;;  %p150_p10 = scmp.lt.s32.totalorder %s2164_s18, 5 }
  0x1a   : > { %p2268_p11 = por %p137_p7, %p39_p0  ;;  %p2272_p12 = por %p143_p8, %p45_p3 }
  0x1b   : > { %p2276_p13 = pnand %p1675_p9, %p150_p10  ;;  %s2853_s2 = sld [smem:[#allocation29_spill]] }
  0x1c   : > { %s2850_s27 = scalar_select %p2268_p11, 1, 0 }
  0x1d   : > { %s2851_s28 = scalar_select %p2272_p12, 1, 0 }
  0x1e   : > { %s2852_s29 = scalar_select %p2276_p13, 1, 0 }
  0x1f   : > { %p1839_p1 = pneg %p2276_p13  ;;  %s2854_s3 = sld [smem:[#allocation30_spill]] }
  0x21   : > { %s163_s6 = sshll.u32 %s2853_s2, 4  ;;  %p2290_p0 = pnand %p1839_p1, %p2837_p4  ;;  %s164_s6 = int_to_ptr.vmem [resolvable:$true] %s163_s6 }
  0x22   : > { %s2080_s11 = scalar_lea.vmem %s164_s6, 64  ;;  %p2088_p9 = scmp.lt.s32.totalorder %s164_s6, %s164_s6 }
  0x23   : > { %p2081_p2 = scmp.ne.s32.totalorder %s164_s6, %s2080_s11  ;;  %p2082_p3 = pneg %p2290_p0 }
  0x24   : > { %p2089_p10 = scmp.lt.s32.totalorder %s2080_s11, %s2080_s11 }
  0x25   : > { %s174_s9 = sshll.u32 %s2854_s3, 4  ;;  %p2083_p7 = pnand %p2082_p3, %p2081_p2  ;;  %s175_s9 = int_to_ptr.vmem [resolvable:$true] %s174_s9 }
  0x26   : > { %p2090_p12 = por %p2089_p10, %p2088_p9 }
  0x27   : > { %p2084_p8 = pneg %p2083_p7 }
  0x29   : > { %p2091_p11 = pnand %p2090_p12, %p2084_p8 }
  0x2b   : > { %2094 = shalt.err (!%p2091_p11)
}
  0x2c   : > { %s2170_s12 = smov [#allocation8]   ;;  %s2095_s13 = scalar_lea.vmem %s175_s9, 16 }
  0x2d   : > { %1842 = dma.vmem_to_smem (!%p2290_p0), %s164_s6, 64, %s2170_s12, [#allocation5]  }
  0x2e   : > { %p2096_p1 = scmp.ne.s32.totalorder %s175_s9, %s2095_s13  ;;  %p2103_p13 = scmp.lt.s32.totalorder %s175_s9, %s175_s9 }
  0x2f   : > { %p2104_p5 = scmp.lt.s32.totalorder %s2095_s13, %s2095_s13 }
  0x30   : > { %p2098_p4 = pnand %p2096_p1, %p2082_p3 }
  0x31   : > { %p2105_p2 = por %p2104_p5, %p2103_p13 }
  0x32   : > { %p2099_p6 = pneg %p2098_p4 }
  0x34   : > { %p2106_p7 = pnand %p2105_p2, %p2099_p6 }
  0x36   : > { %2109 = shalt.err (!%p2106_p7)
}
  0x37   : > { %s2171_s14 = smov [#allocation9]   ;;  %p1678_p12 = scmp.ge.s32.totalorder %s2164_s18, 4 }
  0x38   : > { %1845 = dma.vmem_to_smem (!%p2290_p0), %s175_s9, 16, %s2171_s14, [#allocation10]  }
  0x39   : > { %181 = sbr.rel (%p1678_p12) target bundleno = 92 (0x5c), region = 24 }
  0x40   : > { %s2302_s20 = sand.u32 1, %s2160_s17   ;;  %s1799_s23 = sshll.u32 %s2164_s18, 9 }
  0x41   : > { %s1802_s22 = smul.u32 96, %s2302_s20  ;;  %s2172_s30 = smov 2048  }
  0x42   : > { %p2856_p4 = scmp.ne.s32.totalorder %s2848_s25, 0  ;;  %s2857_s0 = sld [smem:[#allocation27_spill]] }
  0x43   : > { %s189_s10 = scalar_lea.vmem [#allocation2], %s1802_s22  ;;  %s2173_s12 = smov 512  }
  0x44   : > { %1810 = sst [smem:[#allocation13]] (%p2856_p4), %s2172_s30  ;;  %s208_s11 = sshll.u32 %s189_s10, 4  ;;  %s209_s11 = int_to_ptr.vmem [resolvable:$true] %s208_s11 }
  0x45   : > { %s1809_s5 = scalar_select %p2856_p4, [#allocation0], [#allocation18] }
  0x46   : > { %1811 = sst [smem:[#allocation13 + $0x1]] (%p2856_p4), %s2173_s12  ;;  %s2174_s13 = smov 4  }
  0x47   : > { %s200_s9 = sld [smem:[%s1809_s5]]   ;;  %s2175_s14 = smov 128  }
  0x48   : > { %s195_s8 = scalar_lea.hbm %s2857_s0, %s1799_s23  ;;  %1812 = sst [smem:[#allocation13 + $0x2]] (%p2856_p4), %s2174_s13 }
  0x49   : > { %1813 = sst [smem:[#allocation13 + $0x3]] (%p2856_p4), %s2175_s14  ;;  %s2176_s30 = smov 8  }
  0x4a   : > { %1814 = sst [smem:[#allocation13 + $0x4]] (%p2856_p4), %s2175_s14  ;;  %s186_s7 = scalar_lea.sflag [#allocation3], %s2302_s20 }
  0x4b   : > { %1815 = sst [smem:[#allocation13 + $0x5]] (%p2856_p4), %s2176_s30  ;;  %s2177_s0 = smov [#allocation12]  }
  0x4d   : > { %s1681_s6 = sshll.u32 %s200_s9, 26 }
  0x4e   : > { %s1682_s5 = sadd.s32 134217728, %s1681_s6 }
  0x4f   : > { %1816 = dma.general (%p2856_p4), %s195_s8, 1536, %s209_s11, %s186_s7, %s2177_s0, [#allocation13], %s1682_s5, 0  }
  0x50   : > { %s2858_s1 = sld [smem:[#allocation28_spill]]  ;;  %s235_s30 = scalar_lea.vmem [#allocation6], %s1802_s22 }
  0x51   : > { %s1817_s14 = scalar_select %p2856_p4, [#allocation0], [#allocation19] }
  0x52   : > { %s254_s9 = sshll.u32 %s235_s30, 4  ;;  %s2178_s2 = smov 2048   ;;  %s255_s9 = int_to_ptr.vmem [resolvable:$true] %s254_s9 }
  0x53   : > { %s246_s6 = sld [smem:[%s1817_s14]]   ;;  %s2179_s0 = smov 512  }
  0x54   : > { %1818 = sst [smem:[#allocation15]] (%p2856_p4), %s2178_s2  ;;  %s2180_s8 = smov 4  }
  0x55   : > { %1819 = sst [smem:[#allocation15 + $0x1]] (%p2856_p4), %s2179_s0  ;;  %s2181_s11 = smov 128  }
  0x56   : > { %s241_s13 = scalar_lea.hbm %s2858_s1, %s1799_s23  ;;  %1820 = sst [smem:[#allocation15 + $0x2]] (%p2856_p4), %s2180_s8 }
  0x57   : > { %1821 = sst [smem:[#allocation15 + $0x3]] (%p2856_p4), %s2181_s11  ;;  %s2182_s23 = smov 8  }
  0x58   : > { %1822 = sst [smem:[#allocation15 + $0x4]] (%p2856_p4), %s2181_s11  ;;  %s232_s7 = scalar_lea.sflag [#allocation7], %s2302_s20 }
  0x59   : > { %s1685_s22 = sshll.u32 %s246_s6, 26  ;;  %1823 = sst [smem:[#allocation15 + $0x5]] (%p2856_p4), %s2182_s23 }
  0x5a   : > { %s1686_s5 = sadd.s32 134217728, %s1685_s22  ;;  %s2183_s10 = smov [#allocation14]  }
  0x5b   : > { %1824 = dma.general (%p2856_p4), %s241_s13, 1536, %s255_s9, %s232_s7, %s2183_s10, [#allocation15], %s1686_s5, 0  }
  0x5c PF: > { %p2859_p5 = scmp.ne.s32.totalorder %s2852_s29, 0 }
  0x5d   : > { %s2349_s2 = sand.u32 (!%p2859_p5), 1, %s2156_s16   ;;  %p2860_p6 = scmp.ne.s32.totalorder (!%p2859_p5), %s2849_s26, 0 }
  0x5e   : > { %279 = sbr.rel (%p2859_p5) target bundleno = 1115 (0x45b), region = 36  ;;  %s282_s14 = scalar_lea.sflag (!%p2859_p5), [#allocation3], %s2349_s2 }
  0x5f   : > { %s2352_s12 = smul.u32 (!%p2859_p5), 96, %s2349_s2 }
  0x61   : > { %s285_s30 = scalar_lea.vmem (!%p2859_p5), [#allocation2], %s2352_s12 }
  0x65   : > { %2131 = dma.done.wait (%p2860_p6), %s282_s14, 1536  }
  0x66   : > { %2133 = vsyncadd (%p2860_p6), %s282_s14, 4294965760  ;;  %s291_s25 = scalar_lea.sflag [#allocation7], %s2349_s2 }
  0x67   : > { %2135 = dma.done.wait (%p2860_p6), %s291_s25, 1536  }
  0x68   : > { %2137 = vsyncadd (%p2860_p6), %s291_s25, 4294965760  ;;  %p2861_p11 = scmp.eq.s32.totalorder %s2237_s19, 0 }
  0x6a   : > { %2139 = dma.done.wait (%p2861_p11), [#allocation5], 64   ;;  %p2862_p13 = pmov %p2861_p11 }
  0x6b   : > { %p2863_p0 = pmov %p2861_p11 }
  0x6c   : > { %2141 = vsyncadd (%p2862_p13), [#allocation5], 4294967232 }
  0x6d   : > { %2143 = dma.done.wait (%p2863_p0), [#allocation10], 16   ;;  %p2864_p3 = pmov %p2863_p0 }
  0x6f   : > { %2145 = vsyncadd (%p2864_p3), [#allocation10], 4294967280 }
  0x70   : > { %307 = sfence }
  0x71   : > { %s2374_s20 = sld [smem:[#allocation8]]  ;;  %s2376_s13 = sld [smem:[#allocation8 + $0x1]] }
  0x72   : > { %s2378_s26 = sld [smem:[#allocation8 + $0x2]]  ;;  %s2380_s9 = sld [smem:[#allocation8 + $0x80]] }
  0x73   : > { %s2382_s6 = sld [smem:[#allocation8 + $0x81]]  ;;  %s2384_s0 = sld [smem:[#allocation8 + $0x82]] }
  0x74   : > { %s2386_s8 = sld [smem:[#allocation8 + $0x100]]  ;;  %s2388_s11 = sld [smem:[#allocation8 + $0x101]] }
  0x75   : > { %s2390_s22 = sld [smem:[#allocation8 + $0x102]]  ;;  %s2392_s23 = sld [smem:[#allocation9]] }
  0x76   : > { %s2394_s5 = sld [smem:[#allocation9 + $0x1]]  ;;  %s2396_s7 = sld [smem:[#allocation9 + $0x2]] }
  0x77   : > { %s2399_s14 = smov 0  }
  0x78 LB: >> { %s2405_s25 = sshll.u32 %s2168_s14, 4  ;;  %s2865_s1 = scalar_lea.vmem [#allocation6], %s2352_s12  ;;  %s2168_s14 = sphi %s2399_s14, %s353_s14  }
  0x79   : >> { %s2410_s29 = scalar_lea.vmem %s285_s30, %s2405_s25 [#allocation2]  ;;  %s2415_s10 = scalar_lea.vmem %s2865_s1, %s2405_s25 [#allocation6] }
  0x7a   : >> { %v356_v0 = vld [vmem:[%s2410_s29] sm:$0xff]  ;;  %v357_v1 = vld [vmem:[%s2410_s29 + $0x8] sm:$0xff]  ;;  %s2870_s1 = scalar_lea.vmem [#allocation11], %s2352_s12  ;;  %s353_s14 = sadd.s32 1, %s2168_s14  }
  0x7b   : >> { %v1702_v2 = vld [vmem:[%s2410_s29 + $0x20] sm:$0xff]  ;;  %v1703_v3 = vld [vmem:[%s2410_s29 + $0x28] sm:$0xff]  ;;  %v1713_v6 = vadd.f32 -0.1, %v356_v0  ;;  %v1714_v10 = vadd.f32 -0.1, %v357_v1 }
  0x7c   : >> { %v1705_v4 = vld [vmem:[%s2410_s29 + $0x40] sm:$0xff]  ;;  %v1706_v5 = vld [vmem:[%s2410_s29 + $0x48] sm:$0xff]  ;;  %v1715_v15 = vadd.f32 0.05, %v1702_v2  ;;  %v1716_v18 = vadd.f32 0.05, %v1703_v3 }
  0x7d   : >> { %v367_v7 = vld [vmem:[%s2415_s10] sm:$0xff]  ;;  %v368_v8 = vld [vmem:[%s2415_s10 + $0x8] sm:$0xff]  ;;  %v1717_v11 = vadd.f32 -3.0, %v1705_v4  ;;  %v1718_v16 = vadd.f32 -3.0, %v1706_v5  ;;  %v381_v20 = vmul.f32 %v1713_v6, %v1713_v6  ;;  %v382_v23 = vmul.f32 %v1714_v10, %v1714_v10  ;;  %p350_p8 = scmp.ge.s32.totalorder %s353_s14, 2  }
  0x7e   : >> { %v1708_v9 = vld [vmem:[%s2415_s10 + $0x20] sm:$0xff]  ;;  %v1709_v12 = vld [vmem:[%s2415_s10 + $0x28] sm:$0xff]  ;;  %v391_v17 = vmul.f32 %v1713_v6, %v367_v7  ;;  %v392_v19 = vmul.f32 %v1714_v10, %v368_v8  ;;  %v403_v26 = vmul.f32 %v367_v7, %v367_v7  ;;  %v383_v27 = vmul.f32 %v1715_v15, %v1715_v15 }
  0x7f   : >> { %v1711_v13 = vld [vmem:[%s2415_s10 + $0x40] sm:$0xff]  ;;  %v1712_v14 = vld [vmem:[%s2415_s10 + $0x48] sm:$0xff]  ;;  %v393_v21 = vmul.f32 %v1715_v15, %v1708_v9  ;;  %v394_v24 = vmul.f32 %v1716_v18, %v1709_v12  ;;  %v404_v29 = vmul.f32 %v368_v8, %v368_v8  ;;  %v405_v30 = vmul.f32 %v1708_v9, %v1708_v9 }
  0x80   : >> { %v397_v22 = vmul.f32 %v1717_v11, %v1711_v13  ;;  %v398_v25 = vmul.f32 %v1718_v16, %v1712_v14  ;;  %v384_v31 = vmul.f32 %v1716_v18, %v1716_v18  ;;  %v406_v33 = vmul.f32 %v1709_v12, %v1709_v12 }
  0x81   : >> { %v395_v28 = vadd.f32 %v393_v21, %v391_v17  ;;  %v396_v32 = vadd.f32 %v394_v24, %v392_v19  ;;  %v409_v34 = vmul.f32 %v1711_v13, %v1711_v13  ;;  %v407_v36 = vadd.f32 %v405_v30, %v403_v26 }
  0x82   : >> { %v410_v37 = vmul.f32 %v1712_v14, %v1712_v14  ;;  %v408_v39 = vadd.f32 %v406_v33, %v404_v29  ;;  %v385_v40 = vadd.f32 %v383_v27, %v381_v20  ;;  %v387_v41 = vmul.f32 %v1717_v11, %v1717_v11 }
  0x83   : >> { %v399_v35 = vadd.f32 %v397_v22, %v395_v28  ;;  %v400_v38 = vadd.f32 %v398_v25, %v396_v32  ;;  %v2431_v43 = vadd.f32 %v409_v34, %v407_v36  ;;  %v386_v44 = vadd.f32 %v384_v31, %v382_v23 }
  0x84   : >> { %v388_v45 = vmul.f32 %v1718_v16, %v1718_v16  ;;  %v2435_v47 = vadd.f32 %v410_v37, %v408_v39  ;;  %v2439_v50 = vadd.f32 %v387_v41, %v385_v40 }
  0x85   : >> { %v2429_v42 = vmul.f32 2.0, %v399_v35  ;;  %v2433_v46 = vmul.f32 2.0, %v400_v38  ;;  %v413_v48 = vmul.f32 0.0, %v2431_v43 }
  0x86   : >> { %v414_v49 = vmul.f32 0.0, %v2435_v47  ;;  %v2442_v52 = vadd.f32 %v388_v45, %v386_v44 }
  0x87   : >> { %v415_v51 = vadd.f32 %v413_v48, %v2429_v42 }
  0x88   : >> { %v416_v53 = vadd.f32 %v414_v49, %v2433_v46 }
  0x89   : >> { %v417_v54 = vmul.f32 0.0, %v415_v51 }
  0x8a   : >> { %v418_v55 = vmul.f32 0.0, %v416_v53 }
  0x8b   : >> { %v419_v56 = vadd.f32 %v417_v54, %v2439_v50 }
  0x8c   : >> { %v420_v57 = vadd.f32 %v418_v55, %v2442_v52 }
  0x8d   : >> { %v421_v58 = vmax.f32 %v419_v56, 0.0 }
  0x8e   : >> { %v422_v59 = vmax.f32 %v420_v57, 0.0 }
  0x8f   : >> { %1916 = vrsqrt.f32 %v421_v58  ;;  %vm425_vm0 = vcmp.eq.f32.partialorder %v421_v58, inf  ;;  %v428_v61 = vand.u32 2147483648, %v421_v58  ;;  %vm427_vm1 = vcmp.eq.f32.partialorder %v421_v58, 0.0 }
  0x90   : >> { %1918 = vrsqrt.f32 %v422_v59  ;;  %vm432_vm2 = vcmp.eq.f32.partialorder %v422_v59, inf  ;;  %v435_v0 = vand.u32 2147483648, %v422_v59  ;;  %vm434_vm3 = vcmp.eq.f32.partialorder %v422_v59, 0.0 }
  0x99   : >> { %v1917_v60 = vpop.eup %1916 }
  0x9a   : >> { %v1919_v62 = vpop.eup %1918  ;;  %v424_v63 = vmul.f32 %v1917_v60, %v421_v58 }
  0x9b   : >> { %v431_v1 = vmul.f32 %v1919_v62, %v422_v59 }
  0x9c   : >> { %v426_v2 = vsel %vm425_vm0, %v421_v58, %v424_v63 }
  0x9d   : >> { %v429_v3 = vsel %vm427_vm1, %v428_v61, %v426_v2  ;;  %v433_v4 = vsel %vm432_vm2, %v422_v59, %v431_v1 }
  0x9e   : >> { %v436_v5 = vsel %vm434_vm3, %v435_v0, %v433_v4  ;;  %v2447_v6 = vadd.f32 -1.0, %v429_v3 }
  0x9f   : >> { %v2449_v7 = vadd.f32 -1.0, %v436_v5 }
  0xa0   : >> { %v441_v8 = vmul.f32 %v2447_v6, %v2431_v43 }
  0xa1   : >> { %v442_v9 = vmul.f32 %v2449_v7, %v2435_v47 }
  0xa2   : >> { %v443_v10 = vadd.f32 %v441_v8, %v2429_v42 }
  0xa3   : >> { %v444_v11 = vadd.f32 %v442_v9, %v2433_v46 }
  0xa4   : >> { %v445_v12 = vmul.f32 %v2447_v6, %v443_v10 }
  0xa5   : >> { %v446_v13 = vmul.f32 %v2449_v7, %v444_v11 }
  0xa6   : >> { %v447_v14 = vadd.f32 %v445_v12, %v2439_v50 }
  0xa7   : >> { %v448_v15 = vadd.f32 %v446_v13, %v2442_v52 }
  0xa8   : >> { %v449_v16 = vmax.f32 %v447_v14, 0.0 }
  0xa9   : >> { %v450_v17 = vmax.f32 %v448_v15, 0.0 }
  0xaa   : >> { %1920 = vrsqrt.f32 %v449_v16  ;;  %vm453_vm4 = vcmp.eq.f32.partialorder %v449_v16, inf  ;;  %v456_v19 = vand.u32 2147483648, %v449_v16  ;;  %vm455_vm5 = vcmp.eq.f32.partialorder %v449_v16, 0.0 }
  0xab   : >> { %1922 = vrsqrt.f32 %v450_v17  ;;  %vm460_vm6 = vcmp.eq.f32.partialorder %v450_v17, inf  ;;  %v463_v22 = vand.u32 2147483648, %v450_v17  ;;  %vm462_vm7 = vcmp.eq.f32.partialorder %v450_v17, 0.0 }
  0xb4   : >> { %v1921_v18 = vpop.eup %1920 }
  0xb5   : >> { %v1923_v20 = vpop.eup %1922  ;;  %v452_v21 = vmul.f32 %v1921_v18, %v449_v16 }
  0xb6   : >> { %v459_v23 = vmul.f32 %v1923_v20, %v450_v17 }
  0xb7   : >> { %v454_v24 = vsel %vm453_vm4, %v449_v16, %v452_v21 }
  0xb8   : >> { %v457_v25 = vsel %vm455_vm5, %v456_v19, %v454_v24  ;;  %v461_v26 = vsel %vm460_vm6, %v450_v17, %v459_v23 }
  0xb9   : >> { %v464_v27 = vsel %vm462_vm7, %v463_v22, %v461_v26  ;;  %v1721_v28 = vadd.f32 -1.0, %v457_v25 }
  0xba   : >> { %v1722_v29 = vadd.f32 -1.0, %v464_v27 }
  0xbb   : >> { %v467_v30 = vadd.f32 %v1721_v28, %v2447_v6  ;;  %v469_v31 = vmax.f32 %v2447_v6, %v1721_v28 }
  0xbc   : >> { %v468_v32 = vadd.f32 %v1722_v29, %v2449_v7  ;;  %v470_v33 = vmax.f32 %v2449_v7, %v1722_v29 }
  0xbd   : >> { %v471_v34 = vmul.f32 %v467_v30, %v2431_v43 }
  0xbe   : >> { %v472_v35 = vmul.f32 %v468_v32, %v2435_v47 }
  0xbf   : >> { %v473_v36 = vadd.f32 %v471_v34, %v2429_v42 }
  0xc0   : >> { %v474_v37 = vadd.f32 %v472_v35, %v2433_v46 }
  0xc1   : >> { %v475_v38 = vmul.f32 %v473_v36, %v467_v30 }
  0xc2   : >> { %v476_v39 = vmul.f32 %v474_v37, %v468_v32 }
  0xc3   : >> { %v477_v40 = vadd.f32 %v475_v38, %v2439_v50 }
  0xc4   : >> { %v478_v41 = vadd.f32 %v476_v39, %v2442_v52 }
  0xc5   : >> { %v479_v44 = vmax.f32 %v477_v40, 0.0 }
  0xc6   : >> { %v480_v45 = vmax.f32 %v478_v41, 0.0 }
  0xc7   : >> { %1924 = vrsqrt.f32 %v479_v44  ;;  %vm483_vm8 = vcmp.eq.f32.partialorder %v479_v44, inf  ;;  %v486_v49 = vand.u32 2147483648, %v479_v44  ;;  %vm485_vm9 = vcmp.eq.f32.partialorder %v479_v44, 0.0 }
  0xc8   : >> { %1926 = vrsqrt.f32 %v480_v45  ;;  %vm490_vm10 = vcmp.eq.f32.partialorder %v480_v45, inf  ;;  %v493_v54 = vand.u32 2147483648, %v480_v45  ;;  %vm492_vm11 = vcmp.eq.f32.partialorder %v480_v45, 0.0 }
  0xd1   : >> { %v1925_v48 = vpop.eup %1924 }
  0xd2   : >> { %v1927_v51 = vpop.eup %1926  ;;  %v482_v53 = vmul.f32 %v1925_v48, %v479_v44 }
  0xd3   : >> { %v489_v55 = vmul.f32 %v1927_v51, %v480_v45 }
  0xd4   : >> { %v484_v56 = vsel %vm483_vm8, %v479_v44, %v482_v53 }
  0xd5   : >> { %v487_v57 = vsel %vm485_vm9, %v486_v49, %v484_v56  ;;  %v491_v58 = vsel %vm490_vm10, %v480_v45, %v489_v55 }
  0xd6   : >> { %v494_v59 = vsel %vm492_vm11, %v493_v54, %v491_v58  ;;  %v1723_v60 = vadd.f32 -1.0, %v487_v57 }
  0xd7   : >> { %v1724_v61 = vadd.f32 -1.0, %v494_v59 }
  0xd8   : >> { %v497_v62 = vadd.f32 %v1723_v60, %v467_v30  ;;  %v2471_v63 = vmax.f32 %v469_v31, %v1723_v60 }
  0xd9   : >> { %v498_v0 = vadd.f32 %v1724_v61, %v468_v32  ;;  %v2473_v1 = vmax.f32 %v470_v33, %v1724_v61 }
  0xda   : >> { %v501_v2 = vmul.f32 %v497_v62, %v2431_v43 }
  0xdb   : >> { %v502_v3 = vmul.f32 %v498_v0, %v2435_v47 }
  0xdc   : >> { %v503_v4 = vadd.f32 %v501_v2, %v2429_v42 }
  0xdd   : >> { %v504_v5 = vadd.f32 %v502_v3, %v2433_v46 }
  0xde   : >> { %v505_v6 = vmul.f32 %v503_v4, %v497_v62 }
  0xdf   : >> { %v506_v7 = vmul.f32 %v504_v5, %v498_v0 }
  0xe0   : >> { %v507_v8 = vadd.f32 %v505_v6, %v2439_v50 }
  0xe1   : >> { %v508_v9 = vadd.f32 %v506_v7, %v2442_v52 }
  0xe2   : >> { %v509_v10 = vmax.f32 %v507_v8, 0.0 }
  0xe3   : >> { %v510_v11 = vmax.f32 %v508_v9, 0.0 }
  0xe4   : >> { %1928 = vrsqrt.f32 %v509_v10  ;;  %vm513_vm12 = vcmp.eq.f32.partialorder %v509_v10, inf  ;;  %v516_v13 = vand.u32 2147483648, %v509_v10  ;;  %vm515_vm13 = vcmp.eq.f32.partialorder %v509_v10, 0.0 }
  0xe5   : >> { %1930 = vrsqrt.f32 %v510_v11  ;;  %vm520_vm14 = vcmp.eq.f32.partialorder %v510_v11, inf  ;;  %v523_v16 = vand.u32 2147483648, %v510_v11  ;;  %vm522_vm15 = vcmp.eq.f32.partialorder %v510_v11, 0.0 }
  0xee   : >> { %v1929_v12 = vpop.eup %1928 }
  0xef   : >> { %v1931_v14 = vpop.eup %1930  ;;  %v512_v15 = vmul.f32 %v1929_v12, %v509_v10 }
  0xf0   : >> { %v519_v17 = vmul.f32 %v1931_v14, %v510_v11 }
  0xf1   : >> { %v514_v18 = vsel %vm513_vm12, %v509_v10, %v512_v15 }
  0xf2   : >> { %v517_v19 = vsel %vm515_vm13, %v516_v13, %v514_v18  ;;  %v521_v20 = vsel %vm520_vm14, %v510_v11, %v519_v17 }
  0xf3   : >> { %v524_v21 = vsel %vm522_vm15, %v523_v16, %v521_v20  ;;  %v1725_v22 = vadd.f32 -1.0, %v517_v19 }
  0xf4   : >> { %v1726_v23 = vadd.f32 -1.0, %v524_v21 }
  0xf5   : >> { %v527_v24 = vadd.f32 %v1725_v22, %v497_v62  ;;  %v529_v25 = vmax.f32 %v2471_v63, %v1725_v22 }
  0xf6   : >> { %v528_v26 = vadd.f32 %v1726_v23, %v498_v0  ;;  %v530_v27 = vmax.f32 %v2473_v1, %v1726_v23 }
  0xf7   : >> { %v531_v28 = vmul.f32 %v527_v24, %v2431_v43 }
  0xf8   : >> { %v532_v29 = vmul.f32 %v528_v26, %v2435_v47 }
  0xf9   : >> { %v533_v30 = vadd.f32 %v531_v28, %v2429_v42 }
  0xfa   : >> { %v534_v31 = vadd.f32 %v532_v29, %v2433_v46 }
  0xfb   : >> { %v535_v32 = vmul.f32 %v533_v30, %v527_v24 }
  0xfc   : >> { %v536_v33 = vmul.f32 %v534_v31, %v528_v26 }
  0xfd   : >> { %v537_v34 = vadd.f32 %v535_v32, %v2439_v50 }
  0xfe   : >> { %v538_v35 = vadd.f32 %v536_v33, %v2442_v52 }
  0xff   : >> { %v539_v36 = vmax.f32 %v537_v34, 0.0 }
 0x100   : >> { %v540_v37 = vmax.f32 %v538_v35, 0.0 }
 0x101   : >> { %1932 = vrsqrt.f32 %v539_v36  ;;  %vm543_vm0 = vcmp.eq.f32.partialorder %v539_v36, inf  ;;  %v546_v39 = vand.u32 2147483648, %v539_v36  ;;  %vm545_vm1 = vcmp.eq.f32.partialorder %v539_v36, 0.0 }
 0x102   : >> { %1934 = vrsqrt.f32 %v540_v37  ;;  %vm550_vm2 = vcmp.eq.f32.partialorder %v540_v37, inf  ;;  %v553_v44 = vand.u32 2147483648, %v540_v37  ;;  %vm552_vm3 = vcmp.eq.f32.partialorder %v540_v37, 0.0 }
 0x10b   : >> { %v1933_v38 = vpop.eup %1932 }
 0x10c   : >> { %v1935_v40 = vpop.eup %1934  ;;  %v542_v41 = vmul.f32 %v1933_v38, %v539_v36 }
 0x10d   : >> { %v549_v45 = vmul.f32 %v1935_v40, %v540_v37 }
 0x10e   : >> { %v544_v48 = vsel %vm543_vm0, %v539_v36, %v542_v41 }
 0x10f   : >> { %v547_v49 = vsel %vm545_vm1, %v546_v39, %v544_v48  ;;  %v551_v51 = vsel %vm550_vm2, %v540_v37, %v549_v45 }
 0x110   : >> { %v554_v53 = vsel %vm552_vm3, %v553_v44, %v551_v51  ;;  %v1727_v54 = vadd.f32 -1.0, %v547_v49 }
 0x111   : >> { %v1728_v55 = vadd.f32 -1.0, %v554_v53 }
 0x112   : >> { %v557_v56 = vadd.f32 %v1727_v54, %v527_v24  ;;  %v2489_v57 = vmax.f32 %v529_v25, %v1727_v54 }
 0x113   : >> { %v558_v58 = vadd.f32 %v1728_v55, %v528_v26  ;;  %v2491_v59 = vmax.f32 %v530_v27, %v1728_v55 }
 0x114   : >> { %v561_v60 = vmul.f32 %v557_v56, %v2431_v43 }
 0x115   : >> { %v562_v61 = vmul.f32 %v558_v58, %v2435_v47 }
 0x116   : >> { %v563_v62 = vadd.f32 %v561_v60, %v2429_v42 }
 0x117   : >> { %v564_v63 = vadd.f32 %v562_v61, %v2433_v46 }
 0x118   : >> { %v565_v0 = vmul.f32 %v563_v62, %v557_v56 }
 0x119   : >> { %v566_v1 = vmul.f32 %v564_v63, %v558_v58 }
 0x11a   : >> { %v567_v2 = vadd.f32 %v565_v0, %v2439_v50 }
 0x11b   : >> { %v568_v3 = vadd.f32 %v566_v1, %v2442_v52 }
 0x11c   : >> { %v569_v4 = vmax.f32 %v567_v2, 0.0 }
 0x11d   : >> { %v570_v5 = vmax.f32 %v568_v3, 0.0 }
 0x11e   : >> { %1936 = vrsqrt.f32 %v569_v4  ;;  %vm573_vm4 = vcmp.eq.f32.partialorder %v569_v4, inf  ;;  %v576_v7 = vand.u32 2147483648, %v569_v4  ;;  %vm575_vm5 = vcmp.eq.f32.partialorder %v569_v4, 0.0 }
 0x11f   : >> { %1938 = vrsqrt.f32 %v570_v5  ;;  %vm580_vm6 = vcmp.eq.f32.partialorder %v570_v5, inf  ;;  %v583_v10 = vand.u32 2147483648, %v570_v5  ;;  %vm582_vm7 = vcmp.eq.f32.partialorder %v570_v5, 0.0 }
 0x128   : >> { %v1937_v6 = vpop.eup %1936 }
 0x129   : >> { %v1939_v8 = vpop.eup %1938  ;;  %v572_v9 = vmul.f32 %v1937_v6, %v569_v4 }
 0x12a   : >> { %v579_v11 = vmul.f32 %v1939_v8, %v570_v5 }
 0x12b   : >> { %v574_v12 = vsel %vm573_vm4, %v569_v4, %v572_v9 }
 0x12c   : >> { %v577_v13 = vsel %vm575_vm5, %v576_v7, %v574_v12  ;;  %v581_v14 = vsel %vm580_vm6, %v570_v5, %v579_v11 }
 0x12d   : >> { %v584_v15 = vsel %vm582_vm7, %v583_v10, %v581_v14  ;;  %v1729_v16 = vadd.f32 -1.0, %v577_v13 }
 0x12e   : >> { %v1730_v17 = vadd.f32 -1.0, %v584_v15 }
 0x12f   : >> { %v587_v18 = vadd.f32 %v1729_v16, %v557_v56  ;;  %v589_v19 = vmax.f32 %v2489_v57, %v1729_v16 }
 0x130   : >> { %v588_v20 = vadd.f32 %v1730_v17, %v558_v58  ;;  %v590_v21 = vmax.f32 %v2491_v59, %v1730_v17 }
 0x131   : >> { %v591_v22 = vmul.f32 %v587_v18, %v2431_v43 }
 0x132   : >> { %v592_v23 = vmul.f32 %v588_v20, %v2435_v47 }
 0x133   : >> { %v593_v24 = vadd.f32 %v591_v22, %v2429_v42 }
 0x134   : >> { %v594_v25 = vadd.f32 %v592_v23, %v2433_v46 }
 0x135   : >> { %v595_v26 = vmul.f32 %v593_v24, %v587_v18 }
 0x136   : >> { %v596_v27 = vmul.f32 %v594_v25, %v588_v20 }
 0x137   : >> { %v597_v28 = vadd.f32 %v595_v26, %v2439_v50 }
 0x138   : >> { %v598_v29 = vadd.f32 %v596_v27, %v2442_v52 }
 0x139   : >> { %v599_v30 = vmax.f32 %v597_v28, 0.0 }
 0x13a   : >> { %v600_v31 = vmax.f32 %v598_v29, 0.0 }
 0x13b   : >> { %1940 = vrsqrt.f32 %v599_v30  ;;  %vm603_vm8 = vcmp.eq.f32.partialorder %v599_v30, inf  ;;  %v606_v33 = vand.u32 2147483648, %v599_v30  ;;  %vm605_vm9 = vcmp.eq.f32.partialorder %v599_v30, 0.0 }
 0x13c   : >> { %1942 = vrsqrt.f32 %v600_v31  ;;  %vm610_vm10 = vcmp.eq.f32.partialorder %v600_v31, inf  ;;  %v613_v36 = vand.u32 2147483648, %v600_v31  ;;  %vm612_vm11 = vcmp.eq.f32.partialorder %v600_v31, 0.0 }
 0x145   : >> { %v1941_v32 = vpop.eup %1940 }
 0x146   : >> { %v1943_v34 = vpop.eup %1942  ;;  %v602_v35 = vmul.f32 %v1941_v32, %v599_v30 }
 0x147   : >> { %v609_v37 = vmul.f32 %v1943_v34, %v600_v31 }
 0x148   : >> { %v604_v38 = vsel %vm603_vm8, %v599_v30, %v602_v35 }
 0x149   : >> { %v607_v39 = vsel %vm605_vm9, %v606_v33, %v604_v38  ;;  %v611_v40 = vsel %vm610_vm10, %v600_v31, %v609_v37 }
 0x14a   : >> { %v614_v41 = vsel %vm612_vm11, %v613_v36, %v611_v40  ;;  %v1731_v44 = vadd.f32 -1.0, %v607_v39 }
 0x14b   : >> { %v1732_v45 = vadd.f32 -1.0, %v614_v41 }
 0x14c   : >> { %v617_v48 = vadd.f32 %v1731_v44, %v587_v18  ;;  %v2507_v49 = vmax.f32 %v589_v19, %v1731_v44 }
 0x14d   : >> { %v618_v51 = vadd.f32 %v1732_v45, %v588_v20  ;;  %v2509_v53 = vmax.f32 %v590_v21, %v1732_v45 }
 0x14e   : >> { %v621_v54 = vmul.f32 %v617_v48, %v2431_v43 }
 0x14f   : >> { %v622_v55 = vmul.f32 %v618_v51, %v2435_v47 }
 0x150   : >> { %v623_v56 = vadd.f32 %v621_v54, %v2429_v42 }
 0x151   : >> { %v624_v57 = vadd.f32 %v622_v55, %v2433_v46 }
 0x152   : >> { %v625_v58 = vmul.f32 %v623_v56, %v617_v48 }
 0x153   : >> { %v626_v59 = vmul.f32 %v624_v57, %v618_v51 }
 0x154   : >> { %v627_v60 = vadd.f32 %v625_v58, %v2439_v50 }
 0x155   : >> { %v628_v61 = vadd.f32 %v626_v59, %v2442_v52 }
 0x156   : >> { %v629_v62 = vmax.f32 %v627_v60, 0.0 }
 0x157   : >> { %v630_v63 = vmax.f32 %v628_v61, 0.0 }
 0x158   : >> { %1944 = vrsqrt.f32 %v629_v62  ;;  %vm633_vm12 = vcmp.eq.f32.partialorder %v629_v62, inf  ;;  %v636_v1 = vand.u32 2147483648, %v629_v62  ;;  %vm635_vm13 = vcmp.eq.f32.partialorder %v629_v62, 0.0 }
 0x159   : >> { %1946 = vrsqrt.f32 %v630_v63  ;;  %vm640_vm14 = vcmp.eq.f32.partialorder %v630_v63, inf  ;;  %v643_v4 = vand.u32 2147483648, %v630_v63  ;;  %vm642_vm15 = vcmp.eq.f32.partialorder %v630_v63, 0.0 }
 0x162   : >> { %v1945_v0 = vpop.eup %1944 }
 0x163   : >> { %v1947_v2 = vpop.eup %1946  ;;  %v632_v3 = vmul.f32 %v1945_v0, %v629_v62 }
 0x164   : >> { %v639_v5 = vmul.f32 %v1947_v2, %v630_v63 }
 0x165   : >> { %v634_v6 = vsel %vm633_vm12, %v629_v62, %v632_v3 }
 0x166   : >> { %v637_v7 = vsel %vm635_vm13, %v636_v1, %v634_v6  ;;  %v641_v8 = vsel %vm640_vm14, %v630_v63, %v639_v5 }
 0x167   : >> { %v644_v9 = vsel %vm642_vm15, %v643_v4, %v641_v8  ;;  %v1733_v10 = vadd.f32 -1.0, %v637_v7 }
 0x168   : >> { %v1734_v11 = vadd.f32 -1.0, %v644_v9 }
 0x169   : >> { %v647_v12 = vadd.f32 %v1733_v10, %v617_v48  ;;  %v649_v13 = vmax.f32 %v2507_v49, %v1733_v10 }
 0x16a   : >> { %v648_v14 = vadd.f32 %v1734_v11, %v618_v51  ;;  %v650_v15 = vmax.f32 %v2509_v53, %v1734_v11 }
 0x16b   : >> { %v651_v16 = vmul.f32 %v647_v12, %v2431_v43 }
 0x16c   : >> { %v652_v17 = vmul.f32 %v648_v14, %v2435_v47 }
 0x16d   : >> { %v653_v18 = vadd.f32 %v651_v16, %v2429_v42 }
 0x16e   : >> { %v654_v19 = vadd.f32 %v652_v17, %v2433_v46 }
 0x16f   : >> { %v655_v20 = vmul.f32 %v653_v18, %v647_v12 }
 0x170   : >> { %v656_v21 = vmul.f32 %v654_v19, %v648_v14 }
 0x171   : >> { %v657_v22 = vadd.f32 %v655_v20, %v2439_v50 }
 0x172   : >> { %v658_v23 = vadd.f32 %v656_v21, %v2442_v52 }
 0x173   : >> { %v659_v24 = vmax.f32 %v657_v22, 0.0 }
 0x174   : >> { %v660_v25 = vmax.f32 %v658_v23, 0.0 }
 0x175   : >> { %1948 = vrsqrt.f32 %v659_v24  ;;  %vm663_vm0 = vcmp.eq.f32.partialorder %v659_v24, inf  ;;  %v666_v27 = vand.u32 2147483648, %v659_v24  ;;  %vm665_vm1 = vcmp.eq.f32.partialorder %v659_v24, 0.0 }
 0x176   : >> { %1950 = vrsqrt.f32 %v660_v25  ;;  %vm670_vm2 = vcmp.eq.f32.partialorder %v660_v25, inf  ;;  %v673_v30 = vand.u32 2147483648, %v660_v25  ;;  %vm672_vm3 = vcmp.eq.f32.partialorder %v660_v25, 0.0 }
 0x17f   : >> { %v1949_v26 = vpop.eup %1948 }
 0x180   : >> { %v1951_v28 = vpop.eup %1950  ;;  %v662_v29 = vmul.f32 %v1949_v26, %v659_v24 }
 0x181   : >> { %v669_v31 = vmul.f32 %v1951_v28, %v660_v25 }
 0x182   : >> { %v664_v32 = vsel %vm663_vm0, %v659_v24, %v662_v29 }
 0x183   : >> { %v667_v33 = vsel %vm665_vm1, %v666_v27, %v664_v32  ;;  %v671_v34 = vsel %vm670_vm2, %v660_v25, %v669_v31 }
 0x184   : >> { %v674_v35 = vsel %vm672_vm3, %v673_v30, %v671_v34  ;;  %v1735_v36 = vadd.f32 -1.0, %v667_v33 }
 0x185   : >> { %v1736_v37 = vadd.f32 -1.0, %v674_v35 }
 0x186   : >> { %v677_v38 = vadd.f32 %v1735_v36, %v647_v12  ;;  %v2525_v39 = vmax.f32 %v649_v13, %v1735_v36 }
 0x187   : >> { %v678_v40 = vadd.f32 %v1736_v37, %v648_v14  ;;  %v2527_v41 = vmax.f32 %v650_v15, %v1736_v37 }
 0x188   : >> { %v681_v44 = vmul.f32 %v677_v38, %v2431_v43 }
 0x189   : >> { %v682_v45 = vmul.f32 %v678_v40, %v2435_v47 }
 0x18a   : >> { %v683_v48 = vadd.f32 %v681_v44, %v2429_v42 }
 0x18b   : >> { %v684_v49 = vadd.f32 %v682_v45, %v2433_v46 }
 0x18c   : >> { %v685_v51 = vmul.f32 %v683_v48, %v677_v38 }
 0x18d   : >> { %v686_v53 = vmul.f32 %v684_v49, %v678_v40 }
 0x18e   : >> { %v687_v54 = vadd.f32 %v685_v51, %v2439_v50 }
 0x18f   : >> { %v688_v55 = vadd.f32 %v686_v53, %v2442_v52 }
 0x190   : >> { %v689_v56 = vmax.f32 %v687_v54, 0.0 }
 0x191   : >> { %v690_v57 = vmax.f32 %v688_v55, 0.0 }
 0x192   : >> { %1952 = vrsqrt.f32 %v689_v56  ;;  %vm693_vm4 = vcmp.eq.f32.partialorder %v689_v56, inf  ;;  %v696_v59 = vand.u32 2147483648, %v689_v56  ;;  %vm695_vm5 = vcmp.eq.f32.partialorder %v689_v56, 0.0 }
 0x193   : >> { %1954 = vrsqrt.f32 %v690_v57  ;;  %vm700_vm6 = vcmp.eq.f32.partialorder %v690_v57, inf  ;;  %v703_v62 = vand.u32 2147483648, %v690_v57  ;;  %vm702_vm7 = vcmp.eq.f32.partialorder %v690_v57, 0.0 }
 0x19c   : >> { %v1953_v58 = vpop.eup %1952 }
 0x19d   : >> { %v1955_v60 = vpop.eup %1954  ;;  %v692_v61 = vmul.f32 %v1953_v58, %v689_v56 }
 0x19e   : >> { %v699_v63 = vmul.f32 %v1955_v60, %v690_v57 }
 0x19f   : >> { %v694_v0 = vsel %vm693_vm4, %v689_v56, %v692_v61 }
 0x1a0   : >> { %v697_v1 = vsel %vm695_vm5, %v696_v59, %v694_v0  ;;  %v701_v2 = vsel %vm700_vm6, %v690_v57, %v699_v63 }
 0x1a1   : >> { %v704_v3 = vsel %vm702_vm7, %v703_v62, %v701_v2  ;;  %v1737_v4 = vadd.f32 -1.0, %v697_v1 }
 0x1a2   : >> { %v1738_v5 = vadd.f32 -1.0, %v704_v3 }
 0x1a3   : >> { %v707_v6 = vadd.f32 %v1737_v4, %v677_v38  ;;  %v709_v7 = vmax.f32 %v2525_v39, %v1737_v4 }
 0x1a4   : >> { %v708_v8 = vadd.f32 %v1738_v5, %v678_v40  ;;  %v710_v9 = vmax.f32 %v2527_v41, %v1738_v5 }
 0x1a5   : >> { %v711_v10 = vmul.f32 %v707_v6, %v2431_v43 }
 0x1a6   : >> { %v712_v11 = vmul.f32 %v708_v8, %v2435_v47 }
 0x1a7   : >> { %v713_v12 = vadd.f32 %v711_v10, %v2429_v42 }
 0x1a8   : >> { %v714_v13 = vadd.f32 %v712_v11, %v2433_v46 }
 0x1a9   : >> { %v715_v14 = vmul.f32 %v713_v12, %v707_v6 }
 0x1aa   : >> { %v716_v15 = vmul.f32 %v714_v13, %v708_v8 }
 0x1ab   : >> { %v717_v16 = vadd.f32 %v715_v14, %v2439_v50 }
 0x1ac   : >> { %v718_v17 = vadd.f32 %v716_v15, %v2442_v52 }
 0x1ad   : >> { %v719_v18 = vmax.f32 %v717_v16, 0.0 }
 0x1ae   : >> { %v720_v19 = vmax.f32 %v718_v17, 0.0 }
 0x1af   : >> { %1956 = vrsqrt.f32 %v719_v18  ;;  %vm723_vm8 = vcmp.eq.f32.partialorder %v719_v18, inf  ;;  %v726_v21 = vand.u32 2147483648, %v719_v18  ;;  %vm725_vm9 = vcmp.eq.f32.partialorder %v719_v18, 0.0 }
 0x1b0   : >> { %1958 = vrsqrt.f32 %v720_v19  ;;  %vm730_vm10 = vcmp.eq.f32.partialorder %v720_v19, inf  ;;  %v733_v24 = vand.u32 2147483648, %v720_v19  ;;  %vm732_vm11 = vcmp.eq.f32.partialorder %v720_v19, 0.0 }
 0x1b9   : >> { %v1957_v20 = vpop.eup %1956 }
 0x1ba   : >> { %v1959_v22 = vpop.eup %1958  ;;  %v722_v23 = vmul.f32 %v1957_v20, %v719_v18 }
 0x1bb   : >> { %v729_v25 = vmul.f32 %v1959_v22, %v720_v19 }
 0x1bc   : >> { %v724_v26 = vsel %vm723_vm8, %v719_v18, %v722_v23 }
 0x1bd   : >> { %v727_v27 = vsel %vm725_vm9, %v726_v21, %v724_v26  ;;  %v731_v28 = vsel %vm730_vm10, %v720_v19, %v729_v25 }
 0x1be   : >> { %v734_v29 = vsel %vm732_vm11, %v733_v24, %v731_v28  ;;  %v1739_v30 = vadd.f32 -1.0, %v727_v27 }
 0x1bf   : >> { %v1740_v31 = vadd.f32 -1.0, %v734_v29 }
 0x1c0   : >> { %v737_v32 = vadd.f32 %v1739_v30, %v707_v6  ;;  %v2543_v33 = vmax.f32 %v709_v7, %v1739_v30 }
 0x1c1   : >> { %v738_v34 = vadd.f32 %v1740_v31, %v708_v8  ;;  %v2545_v35 = vmax.f32 %v710_v9, %v1740_v31 }
 0x1c2   : >> { %v741_v36 = vmul.f32 %v737_v32, %v2431_v43 }
 0x1c3   : >> { %v742_v37 = vmul.f32 %v738_v34, %v2435_v47 }
 0x1c4   : >> { %v743_v38 = vadd.f32 %v741_v36, %v2429_v42 }
 0x1c5   : >> { %v744_v39 = vadd.f32 %v742_v37, %v2433_v46 }
 0x1c6   : >> { %v745_v40 = vmul.f32 %v743_v38, %v737_v32 }
 0x1c7   : >> { %v746_v41 = vmul.f32 %v744_v39, %v738_v34 }
 0x1c8   : >> { %v747_v44 = vadd.f32 %v745_v40, %v2439_v50 }
 0x1c9   : >> { %v748_v45 = vadd.f32 %v746_v41, %v2442_v52 }
 0x1ca   : >> { %v749_v48 = vmax.f32 %v747_v44, 0.0 }
 0x1cb   : >> { %v750_v49 = vmax.f32 %v748_v45, 0.0 }
 0x1cc   : >> { %1960 = vrsqrt.f32 %v749_v48  ;;  %vm753_vm12 = vcmp.eq.f32.partialorder %v749_v48, inf  ;;  %v756_v53 = vand.u32 2147483648, %v749_v48  ;;  %vm755_vm13 = vcmp.eq.f32.partialorder %v749_v48, 0.0 }
 0x1cd   : >> { %1962 = vrsqrt.f32 %v750_v49  ;;  %vm760_vm14 = vcmp.eq.f32.partialorder %v750_v49, inf  ;;  %v763_v56 = vand.u32 2147483648, %v750_v49  ;;  %vm762_vm15 = vcmp.eq.f32.partialorder %v750_v49, 0.0 }
 0x1d6   : >> { %v1961_v51 = vpop.eup %1960 }
 0x1d7   : >> { %v1963_v54 = vpop.eup %1962  ;;  %v752_v55 = vmul.f32 %v1961_v51, %v749_v48 }
 0x1d8   : >> { %v759_v57 = vmul.f32 %v1963_v54, %v750_v49 }
 0x1d9   : >> { %v754_v58 = vsel %vm753_vm12, %v749_v48, %v752_v55 }
 0x1da   : >> { %v757_v59 = vsel %vm755_vm13, %v756_v53, %v754_v58  ;;  %v761_v60 = vsel %vm760_vm14, %v750_v49, %v759_v57 }
 0x1db   : >> { %v764_v61 = vsel %vm762_vm15, %v763_v56, %v761_v60  ;;  %v1741_v62 = vadd.f32 -1.0, %v757_v59 }
 0x1dc   : >> { %v1742_v63 = vadd.f32 -1.0, %v764_v61 }
 0x1dd   : >> { %v767_v0 = vadd.f32 %v1741_v62, %v737_v32  ;;  %v769_v1 = vmax.f32 %v2543_v33, %v1741_v62 }
 0x1de   : >> { %v768_v2 = vadd.f32 %v1742_v63, %v738_v34  ;;  %v770_v3 = vmax.f32 %v2545_v35, %v1742_v63 }
 0x1df   : >> { %v771_v4 = vmul.f32 %v767_v0, %v2431_v43 }
 0x1e0   : >> { %v772_v5 = vmul.f32 %v768_v2, %v2435_v47 }
 0x1e1   : >> { %v773_v6 = vadd.f32 %v771_v4, %v2429_v42 }
 0x1e2   : >> { %v774_v7 = vadd.f32 %v772_v5, %v2433_v46 }
 0x1e3   : >> { %v775_v8 = vmul.f32 %v773_v6, %v767_v0 }
 0x1e4   : >> { %v776_v9 = vmul.f32 %v774_v7, %v768_v2 }
 0x1e5   : >> { %v777_v10 = vadd.f32 %v775_v8, %v2439_v50 }
 0x1e6   : >> { %v778_v11 = vadd.f32 %v776_v9, %v2442_v52 }
 0x1e7   : >> { %v779_v12 = vmax.f32 %v777_v10, 0.0 }
 0x1e8   : >> { %v780_v13 = vmax.f32 %v778_v11, 0.0 }
 0x1e9   : >> { %1964 = vrsqrt.f32 %v779_v12  ;;  %vm783_vm0 = vcmp.eq.f32.partialorder %v779_v12, inf  ;;  %v786_v15 = vand.u32 2147483648, %v779_v12  ;;  %vm785_vm1 = vcmp.eq.f32.partialorder %v779_v12, 0.0 }
 0x1ea   : >> { %1966 = vrsqrt.f32 %v780_v13  ;;  %vm790_vm2 = vcmp.eq.f32.partialorder %v780_v13, inf  ;;  %v793_v18 = vand.u32 2147483648, %v780_v13  ;;  %vm792_vm3 = vcmp.eq.f32.partialorder %v780_v13, 0.0 }
 0x1f3   : >> { %v1965_v14 = vpop.eup %1964 }
 0x1f4   : >> { %v1967_v16 = vpop.eup %1966  ;;  %v782_v17 = vmul.f32 %v1965_v14, %v779_v12 }
 0x1f5   : >> { %v789_v19 = vmul.f32 %v1967_v16, %v780_v13 }
 0x1f6   : >> { %v784_v20 = vsel %vm783_vm0, %v779_v12, %v782_v17 }
 0x1f7   : >> { %v787_v21 = vsel %vm785_vm1, %v786_v15, %v784_v20  ;;  %v791_v22 = vsel %vm790_vm2, %v780_v13, %v789_v19 }
 0x1f8   : >> { %v794_v23 = vsel %vm792_vm3, %v793_v18, %v791_v22  ;;  %v1743_v24 = vadd.f32 -1.0, %v787_v21 }
 0x1f9   : >> { %v1744_v25 = vadd.f32 -1.0, %v794_v23 }
 0x1fa   : >> { %v797_v26 = vadd.f32 %v1743_v24, %v767_v0  ;;  %v2561_v27 = vmax.f32 %v769_v1, %v1743_v24 }
 0x1fb   : >> { %v798_v28 = vadd.f32 %v1744_v25, %v768_v2  ;;  %v2563_v29 = vmax.f32 %v770_v3, %v1744_v25 }
 0x1fc   : >> { %v801_v30 = vmul.f32 %v797_v26, %v2431_v43 }
 0x1fd   : >> { %v802_v31 = vmul.f32 %v798_v28, %v2435_v47 }
 0x1fe   : >> { %v803_v32 = vadd.f32 %v801_v30, %v2429_v42 }
 0x1ff   : >> { %v804_v33 = vadd.f32 %v802_v31, %v2433_v46 }
 0x200   : >> { %v805_v34 = vmul.f32 %v803_v32, %v797_v26 }
 0x201   : >> { %v806_v35 = vmul.f32 %v804_v33, %v798_v28 }
 0x202   : >> { %v807_v36 = vadd.f32 %v805_v34, %v2439_v50 }
 0x203   : >> { %v808_v37 = vadd.f32 %v806_v35, %v2442_v52 }
 0x204   : >> { %v809_v38 = vmax.f32 %v807_v36, 0.0 }
 0x205   : >> { %v810_v39 = vmax.f32 %v808_v37, 0.0 }
 0x206   : >> { %1968 = vrsqrt.f32 %v809_v38  ;;  %vm813_vm4 = vcmp.eq.f32.partialorder %v809_v38, inf  ;;  %v816_v41 = vand.u32 2147483648, %v809_v38  ;;  %vm815_vm5 = vcmp.eq.f32.partialorder %v809_v38, 0.0 }
 0x207   : >> { %1970 = vrsqrt.f32 %v810_v39  ;;  %vm820_vm6 = vcmp.eq.f32.partialorder %v810_v39, inf  ;;  %v823_v48 = vand.u32 2147483648, %v810_v39  ;;  %vm822_vm7 = vcmp.eq.f32.partialorder %v810_v39, 0.0 }
 0x210   : >> { %v1969_v40 = vpop.eup %1968 }
 0x211   : >> { %v1971_v44 = vpop.eup %1970  ;;  %v812_v45 = vmul.f32 %v1969_v40, %v809_v38 }
 0x212   : >> { %v819_v49 = vmul.f32 %v1971_v44, %v810_v39 }
 0x213   : >> { %v814_v51 = vsel %vm813_vm4, %v809_v38, %v812_v45 }
 0x214   : >> { %v817_v53 = vsel %vm815_vm5, %v816_v41, %v814_v51  ;;  %v821_v54 = vsel %vm820_vm6, %v810_v39, %v819_v49 }
 0x215   : >> { %v824_v55 = vsel %vm822_vm7, %v823_v48, %v821_v54  ;;  %v1745_v56 = vadd.f32 -1.0, %v817_v53 }
 0x216   : >> { %v1746_v57 = vadd.f32 -1.0, %v824_v55 }
 0x217   : >> { %v827_v58 = vadd.f32 %v1745_v56, %v797_v26  ;;  %v829_v59 = vmax.f32 %v2561_v27, %v1745_v56 }
 0x218   : >> { %v828_v60 = vadd.f32 %v1746_v57, %v798_v28  ;;  %v830_v61 = vmax.f32 %v2563_v29, %v1746_v57 }
 0x219   : >> { %v831_v62 = vmul.f32 %v827_v58, %v2431_v43 }
 0x21a   : >> { %v832_v63 = vmul.f32 %v828_v60, %v2435_v47 }
 0x21b   : >> { %v833_v0 = vadd.f32 %v831_v62, %v2429_v42 }
 0x21c   : >> { %v834_v1 = vadd.f32 %v832_v63, %v2433_v46 }
 0x21d   : >> { %v835_v2 = vmul.f32 %v833_v0, %v827_v58 }
 0x21e   : >> { %v836_v3 = vmul.f32 %v834_v1, %v828_v60 }
 0x21f   : >> { %v837_v4 = vadd.f32 %v835_v2, %v2439_v50 }
 0x220   : >> { %v838_v5 = vadd.f32 %v836_v3, %v2442_v52 }
 0x221   : >> { %v839_v6 = vmax.f32 %v837_v4, 0.0 }
 0x222   : >> { %v840_v7 = vmax.f32 %v838_v5, 0.0 }
 0x223   : >> { %1972 = vrsqrt.f32 %v839_v6  ;;  %vm843_vm8 = vcmp.eq.f32.partialorder %v839_v6, inf  ;;  %v846_v9 = vand.u32 2147483648, %v839_v6  ;;  %vm845_vm9 = vcmp.eq.f32.partialorder %v839_v6, 0.0 }
 0x224   : >> { %1974 = vrsqrt.f32 %v840_v7  ;;  %vm850_vm10 = vcmp.eq.f32.partialorder %v840_v7, inf  ;;  %v853_v12 = vand.u32 2147483648, %v840_v7  ;;  %vm852_vm11 = vcmp.eq.f32.partialorder %v840_v7, 0.0 }
 0x22d   : >> { %v1973_v8 = vpop.eup %1972 }
 0x22e   : >> { %v1975_v10 = vpop.eup %1974  ;;  %v842_v11 = vmul.f32 %v1973_v8, %v839_v6 }
 0x22f   : >> { %v849_v13 = vmul.f32 %v1975_v10, %v840_v7 }
 0x230   : >> { %v844_v14 = vsel %vm843_vm8, %v839_v6, %v842_v11 }
 0x231   : >> { %v847_v15 = vsel %vm845_vm9, %v846_v9, %v844_v14  ;;  %v851_v16 = vsel %vm850_vm10, %v840_v7, %v849_v13 }
 0x232   : >> { %v854_v17 = vsel %vm852_vm11, %v853_v12, %v851_v16  ;;  %v1747_v18 = vadd.f32 -1.0, %v847_v15 }
 0x233   : >> { %v1748_v19 = vadd.f32 -1.0, %v854_v17 }
 0x234   : >> { %v857_v20 = vadd.f32 %v1747_v18, %v827_v58  ;;  %v2579_v21 = vmax.f32 %v829_v59, %v1747_v18 }
 0x235   : >> { %v858_v22 = vadd.f32 %v1748_v19, %v828_v60  ;;  %v2581_v23 = vmax.f32 %v830_v61, %v1748_v19 }
 0x236   : >> { %v861_v24 = vmul.f32 %v857_v20, %v2431_v43 }
 0x237   : >> { %v862_v25 = vmul.f32 %v858_v22, %v2435_v47 }
 0x238   : >> { %v863_v26 = vadd.f32 %v861_v24, %v2429_v42 }
 0x239   : >> { %v864_v27 = vadd.f32 %v862_v25, %v2433_v46 }
 0x23a   : >> { %v865_v28 = vmul.f32 %v863_v26, %v857_v20 }
 0x23b   : >> { %v866_v29 = vmul.f32 %v864_v27, %v858_v22 }
 0x23c   : >> { %v867_v30 = vadd.f32 %v865_v28, %v2439_v50 }
 0x23d   : >> { %v868_v31 = vadd.f32 %v866_v29, %v2442_v52 }
 0x23e   : >> { %v869_v32 = vmax.f32 %v867_v30, 0.0 }
 0x23f   : >> { %v870_v33 = vmax.f32 %v868_v31, 0.0 }
 0x240   : >> { %1976 = vrsqrt.f32 %v869_v32  ;;  %vm873_vm12 = vcmp.eq.f32.partialorder %v869_v32, inf  ;;  %v876_v35 = vand.u32 2147483648, %v869_v32  ;;  %vm875_vm13 = vcmp.eq.f32.partialorder %v869_v32, 0.0 }
 0x241   : >> { %1978 = vrsqrt.f32 %v870_v33  ;;  %vm880_vm14 = vcmp.eq.f32.partialorder %v870_v33, inf  ;;  %v883_v38 = vand.u32 2147483648, %v870_v33  ;;  %vm882_vm15 = vcmp.eq.f32.partialorder %v870_v33, 0.0 }
 0x24a   : >> { %v1977_v34 = vpop.eup %1976 }
 0x24b   : >> { %v1979_v36 = vpop.eup %1978  ;;  %v872_v37 = vmul.f32 %v1977_v34, %v869_v32 }
 0x24c   : >> { %v879_v39 = vmul.f32 %v1979_v36, %v870_v33 }
 0x24d   : >> { %v874_v40 = vsel %vm873_vm12, %v869_v32, %v872_v37 }
 0x24e   : >> { %v877_v41 = vsel %vm875_vm13, %v876_v35, %v874_v40  ;;  %v881_v44 = vsel %vm880_vm14, %v870_v33, %v879_v39 }
 0x24f   : >> { %v884_v45 = vsel %vm882_vm15, %v883_v38, %v881_v44  ;;  %v1749_v48 = vadd.f32 -1.0, %v877_v41 }
 0x250   : >> { %v1750_v49 = vadd.f32 -1.0, %v884_v45 }
 0x251   : >> { %v887_v51 = vadd.f32 %v1749_v48, %v857_v20  ;;  %v889_v53 = vmax.f32 %v2579_v21, %v1749_v48 }
 0x252   : >> { %v888_v54 = vadd.f32 %v1750_v49, %v858_v22  ;;  %v890_v55 = vmax.f32 %v2581_v23, %v1750_v49 }
 0x253   : >> { %v891_v56 = vmul.f32 %v887_v51, %v2431_v43 }
 0x254   : >> { %v892_v57 = vmul.f32 %v888_v54, %v2435_v47 }
 0x255   : >> { %v893_v58 = vadd.f32 %v891_v56, %v2429_v42 }
 0x256   : >> { %v894_v59 = vadd.f32 %v892_v57, %v2433_v46 }
 0x257   : >> { %v895_v60 = vmul.f32 %v893_v58, %v887_v51 }
 0x258   : >> { %v896_v61 = vmul.f32 %v894_v59, %v888_v54 }
 0x259   : >> { %v897_v62 = vadd.f32 %v895_v60, %v2439_v50 }
 0x25a   : >> { %v898_v63 = vadd.f32 %v896_v61, %v2442_v52 }
 0x25b   : >> { %v899_v0 = vmax.f32 %v897_v62, 0.0 }
 0x25c   : >> { %v900_v1 = vmax.f32 %v898_v63, 0.0 }
 0x25d   : >> { %1980 = vrsqrt.f32 %v899_v0  ;;  %vm903_vm0 = vcmp.eq.f32.partialorder %v899_v0, inf  ;;  %v906_v3 = vand.u32 2147483648, %v899_v0  ;;  %vm905_vm1 = vcmp.eq.f32.partialorder %v899_v0, 0.0 }
 0x25e   : >> { %1982 = vrsqrt.f32 %v900_v1  ;;  %vm910_vm2 = vcmp.eq.f32.partialorder %v900_v1, inf  ;;  %v913_v6 = vand.u32 2147483648, %v900_v1  ;;  %vm912_vm3 = vcmp.eq.f32.partialorder %v900_v1, 0.0 }
 0x267   : >> { %v1981_v2 = vpop.eup %1980 }
 0x268   : >> { %v1983_v4 = vpop.eup %1982  ;;  %v902_v5 = vmul.f32 %v1981_v2, %v899_v0 }
 0x269   : >> { %v909_v7 = vmul.f32 %v1983_v4, %v900_v1 }
 0x26a   : >> { %v904_v8 = vsel %vm903_vm0, %v899_v0, %v902_v5 }
 0x26b   : >> { %v907_v9 = vsel %vm905_vm1, %v906_v3, %v904_v8  ;;  %v911_v10 = vsel %vm910_vm2, %v900_v1, %v909_v7 }
 0x26c   : >> { %v914_v11 = vsel %vm912_vm3, %v913_v6, %v911_v10  ;;  %v1751_v12 = vadd.f32 -1.0, %v907_v9 }
 0x26d   : >> { %v1752_v13 = vadd.f32 -1.0, %v914_v11 }
 0x26e   : >> { %v917_v14 = vadd.f32 %v1751_v12, %v887_v51  ;;  %v2597_v15 = vmax.f32 %v889_v53, %v1751_v12 }
 0x26f   : >> { %v918_v16 = vadd.f32 %v1752_v13, %v888_v54  ;;  %v2599_v17 = vmax.f32 %v890_v55, %v1752_v13 }
 0x270   : >> { %v921_v18 = vmul.f32 %v917_v14, %v2431_v43 }
 0x271   : >> { %v922_v19 = vmul.f32 %v918_v16, %v2435_v47 }
 0x272   : >> { %v923_v20 = vadd.f32 %v921_v18, %v2429_v42 }
 0x273   : >> { %v924_v21 = vadd.f32 %v922_v19, %v2433_v46 }
 0x274   : >> { %v925_v22 = vmul.f32 %v923_v20, %v917_v14 }
 0x275   : >> { %v926_v23 = vmul.f32 %v924_v21, %v918_v16 }
 0x276   : >> { %v927_v24 = vadd.f32 %v925_v22, %v2439_v50 }
 0x277   : >> { %v928_v25 = vadd.f32 %v926_v23, %v2442_v52 }
 0x278   : >> { %v929_v26 = vmax.f32 %v927_v24, 0.0 }
 0x279   : >> { %v930_v27 = vmax.f32 %v928_v25, 0.0 }
 0x27a   : >> { %1984 = vrsqrt.f32 %v929_v26  ;;  %vm933_vm4 = vcmp.eq.f32.partialorder %v929_v26, inf  ;;  %v936_v29 = vand.u32 2147483648, %v929_v26  ;;  %vm935_vm5 = vcmp.eq.f32.partialorder %v929_v26, 0.0 }
 0x27b   : >> { %1986 = vrsqrt.f32 %v930_v27  ;;  %vm940_vm6 = vcmp.eq.f32.partialorder %v930_v27, inf  ;;  %v943_v32 = vand.u32 2147483648, %v930_v27  ;;  %vm942_vm7 = vcmp.eq.f32.partialorder %v930_v27, 0.0 }
 0x284   : >> { %v1985_v28 = vpop.eup %1984 }
 0x285   : >> { %v1987_v30 = vpop.eup %1986  ;;  %v932_v31 = vmul.f32 %v1985_v28, %v929_v26 }
 0x286   : >> { %v939_v33 = vmul.f32 %v1987_v30, %v930_v27 }
 0x287   : >> { %v934_v34 = vsel %vm933_vm4, %v929_v26, %v932_v31 }
 0x288   : >> { %v937_v35 = vsel %vm935_vm5, %v936_v29, %v934_v34  ;;  %v941_v36 = vsel %vm940_vm6, %v930_v27, %v939_v33 }
 0x289   : >> { %v944_v37 = vsel %vm942_vm7, %v943_v32, %v941_v36  ;;  %v1753_v38 = vadd.f32 -1.0, %v937_v35 }
 0x28a   : >> { %v1754_v39 = vadd.f32 -1.0, %v944_v37 }
 0x28b   : >> { %v947_v40 = vadd.f32 %v1753_v38, %v917_v14  ;;  %v949_v41 = vmax.f32 %v2597_v15, %v1753_v38 }
 0x28c   : >> { %v948_v44 = vadd.f32 %v1754_v39, %v918_v16  ;;  %v950_v45 = vmax.f32 %v2599_v17, %v1754_v39 }
 0x28d   : >> { %v951_v48 = vmul.f32 %v947_v40, %v2431_v43 }
 0x28e   : >> { %v952_v49 = vmul.f32 %v948_v44, %v2435_v47 }
 0x28f   : >> { %v953_v51 = vadd.f32 %v951_v48, %v2429_v42 }
 0x290   : >> { %v954_v53 = vadd.f32 %v952_v49, %v2433_v46 }
 0x291   : >> { %v955_v54 = vmul.f32 %v953_v51, %v947_v40 }
 0x292   : >> { %v956_v55 = vmul.f32 %v954_v53, %v948_v44 }
 0x293   : >> { %v957_v56 = vadd.f32 %v955_v54, %v2439_v50 }
 0x294   : >> { %v958_v57 = vadd.f32 %v956_v55, %v2442_v52 }
 0x295   : >> { %v959_v58 = vmax.f32 %v957_v56, 0.0 }
 0x296   : >> { %v960_v59 = vmax.f32 %v958_v57, 0.0 }
 0x297   : >> { %1988 = vrsqrt.f32 %v959_v58  ;;  %vm963_vm8 = vcmp.eq.f32.partialorder %v959_v58, inf  ;;  %v966_v61 = vand.u32 2147483648, %v959_v58  ;;  %vm965_vm9 = vcmp.eq.f32.partialorder %v959_v58, 0.0 }
 0x298   : >> { %1990 = vrsqrt.f32 %v960_v59  ;;  %vm970_vm10 = vcmp.eq.f32.partialorder %v960_v59, inf  ;;  %v973_v0 = vand.u32 2147483648, %v960_v59  ;;  %vm972_vm11 = vcmp.eq.f32.partialorder %v960_v59, 0.0 }
 0x2a1   : >> { %v1989_v60 = vpop.eup %1988 }
 0x2a2   : >> { %v1991_v62 = vpop.eup %1990  ;;  %v962_v63 = vmul.f32 %v1989_v60, %v959_v58 }
 0x2a3   : >> { %v969_v1 = vmul.f32 %v1991_v62, %v960_v59 }
 0x2a4   : >> { %v964_v2 = vsel %vm963_vm8, %v959_v58, %v962_v63 }
 0x2a5   : >> { %v967_v3 = vsel %vm965_vm9, %v966_v61, %v964_v2  ;;  %v971_v4 = vsel %vm970_vm10, %v960_v59, %v969_v1 }
 0x2a6   : >> { %v974_v5 = vsel %vm972_vm11, %v973_v0, %v971_v4  ;;  %v1755_v6 = vadd.f32 -1.0, %v967_v3 }
 0x2a7   : >> { %v1756_v7 = vadd.f32 -1.0, %v974_v5 }
 0x2a8   : >> { %v977_v8 = vadd.f32 %v1755_v6, %v947_v40  ;;  %v2615_v9 = vmax.f32 %v949_v41, %v1755_v6 }
 0x2a9   : >> { %v978_v10 = vadd.f32 %v1756_v7, %v948_v44  ;;  %v2617_v11 = vmax.f32 %v950_v45, %v1756_v7 }
 0x2aa   : >> { %v981_v12 = vmul.f32 %v977_v8, %v2431_v43 }
 0x2ab   : >> { %v982_v13 = vmul.f32 %v978_v10, %v2435_v47 }
 0x2ac   : >> { %v983_v14 = vadd.f32 %v981_v12, %v2429_v42 }
 0x2ad   : >> { %v984_v15 = vadd.f32 %v982_v13, %v2433_v46 }
 0x2ae   : >> { %v985_v16 = vmul.f32 %v983_v14, %v977_v8 }
 0x2af   : >> { %v986_v17 = vmul.f32 %v984_v15, %v978_v10 }
 0x2b0   : >> { %v987_v18 = vadd.f32 %v985_v16, %v2439_v50 }
 0x2b1   : >> { %v988_v19 = vadd.f32 %v986_v17, %v2442_v52 }
 0x2b2   : >> { %v989_v20 = vmax.f32 %v987_v18, 0.0 }
 0x2b3   : >> { %v990_v21 = vmax.f32 %v988_v19, 0.0 }
 0x2b4   : >> { %1992 = vrsqrt.f32 %v989_v20  ;;  %vm993_vm12 = vcmp.eq.f32.partialorder %v989_v20, inf  ;;  %v996_v23 = vand.u32 2147483648, %v989_v20  ;;  %vm995_vm13 = vcmp.eq.f32.partialorder %v989_v20, 0.0 }
 0x2b5   : >> { %1994 = vrsqrt.f32 %v990_v21  ;;  %vm1000_vm14 = vcmp.eq.f32.partialorder %v990_v21, inf  ;;  %v1003_v26 = vand.u32 2147483648, %v990_v21  ;;  %vm1002_vm15 = vcmp.eq.f32.partialorder %v990_v21, 0.0 }
 0x2be   : >> { %v1993_v22 = vpop.eup %1992 }
 0x2bf   : >> { %v1995_v24 = vpop.eup %1994  ;;  %v992_v25 = vmul.f32 %v1993_v22, %v989_v20 }
 0x2c0   : >> { %v999_v27 = vmul.f32 %v1995_v24, %v990_v21 }
 0x2c1   : >> { %v994_v28 = vsel %vm993_vm12, %v989_v20, %v992_v25 }
 0x2c2   : >> { %v997_v29 = vsel %vm995_vm13, %v996_v23, %v994_v28  ;;  %v1001_v30 = vsel %vm1000_vm14, %v990_v21, %v999_v27 }
 0x2c3   : >> { %v1004_v31 = vsel %vm1002_vm15, %v1003_v26, %v1001_v30  ;;  %v1757_v32 = vadd.f32 -1.0, %v997_v29 }
 0x2c4   : >> { %v1758_v33 = vadd.f32 -1.0, %v1004_v31 }
 0x2c5   : >> { %v1007_v34 = vadd.f32 %v1757_v32, %v977_v8  ;;  %v1009_v35 = vmax.f32 %v2615_v9, %v1757_v32 }
 0x2c6   : >> { %v1008_v36 = vadd.f32 %v1758_v33, %v978_v10  ;;  %v1010_v37 = vmax.f32 %v2617_v11, %v1758_v33 }
 0x2c7   : >> { %v1011_v38 = vmul.f32 %v1007_v34, %v2431_v43 }
 0x2c8   : >> { %v1012_v39 = vmul.f32 %v1008_v36, %v2435_v47 }
 0x2c9   : >> { %v1013_v40 = vadd.f32 %v1011_v38, %v2429_v42 }
 0x2ca   : >> { %v1014_v41 = vadd.f32 %v1012_v39, %v2433_v46 }
 0x2cb   : >> { %v1015_v44 = vmul.f32 %v1013_v40, %v1007_v34 }
 0x2cc   : >> { %v1016_v45 = vmul.f32 %v1014_v41, %v1008_v36 }
 0x2cd   : >> { %v1017_v48 = vadd.f32 %v1015_v44, %v2439_v50 }
 0x2ce   : >> { %v1018_v49 = vadd.f32 %v1016_v45, %v2442_v52 }
 0x2cf   : >> { %v1019_v51 = vmax.f32 %v1017_v48, 0.0 }
 0x2d0   : >> { %v1020_v53 = vmax.f32 %v1018_v49, 0.0 }
 0x2d1   : >> { %1996 = vrsqrt.f32 %v1019_v51  ;;  %vm1023_vm0 = vcmp.eq.f32.partialorder %v1019_v51, inf  ;;  %v1026_v55 = vand.u32 2147483648, %v1019_v51  ;;  %vm1025_vm1 = vcmp.eq.f32.partialorder %v1019_v51, 0.0 }
 0x2d2   : >> { %1998 = vrsqrt.f32 %v1020_v53  ;;  %vm1030_vm2 = vcmp.eq.f32.partialorder %v1020_v53, inf  ;;  %v1033_v58 = vand.u32 2147483648, %v1020_v53  ;;  %vm1032_vm3 = vcmp.eq.f32.partialorder %v1020_v53, 0.0 }
 0x2db   : >> { %v1997_v54 = vpop.eup %1996 }
 0x2dc   : >> { %v1999_v56 = vpop.eup %1998  ;;  %v1022_v57 = vmul.f32 %v1997_v54, %v1019_v51 }
 0x2dd   : >> { %v1029_v59 = vmul.f32 %v1999_v56, %v1020_v53 }
 0x2de   : >> { %v1024_v60 = vsel %vm1023_vm0, %v1019_v51, %v1022_v57 }
 0x2df   : >> { %v1027_v61 = vsel %vm1025_vm1, %v1026_v55, %v1024_v60  ;;  %v1031_v62 = vsel %vm1030_vm2, %v1020_v53, %v1029_v59 }
 0x2e0   : >> { %v1034_v63 = vsel %vm1032_vm3, %v1033_v58, %v1031_v62  ;;  %v1759_v0 = vadd.f32 -1.0, %v1027_v61 }
 0x2e1   : >> { %v1760_v1 = vadd.f32 -1.0, %v1034_v63 }
 0x2e2   : >> { %v1037_v2 = vadd.f32 %v1759_v0, %v1007_v34  ;;  %v2633_v3 = vmax.f32 %v1009_v35, %v1759_v0 }
 0x2e3   : >> { %v1038_v4 = vadd.f32 %v1760_v1, %v1008_v36  ;;  %v2635_v5 = vmax.f32 %v1010_v37, %v1760_v1 }
 0x2e4   : >> { %v1041_v6 = vmul.f32 %v1037_v2, %v2431_v43 }
 0x2e5   : >> { %v1042_v7 = vmul.f32 %v1038_v4, %v2435_v47 }
 0x2e6   : >> { %v1043_v8 = vadd.f32 %v1041_v6, %v2429_v42 }
 0x2e7   : >> { %v1044_v9 = vadd.f32 %v1042_v7, %v2433_v46 }
 0x2e8   : >> { %v1045_v10 = vmul.f32 %v1043_v8, %v1037_v2 }
 0x2e9   : >> { %v1046_v11 = vmul.f32 %v1044_v9, %v1038_v4 }
 0x2ea   : >> { %v1047_v12 = vadd.f32 %v1045_v10, %v2439_v50 }
 0x2eb   : >> { %v1048_v13 = vadd.f32 %v1046_v11, %v2442_v52 }
 0x2ec   : >> { %v1049_v14 = vmax.f32 %v1047_v12, 0.0 }
 0x2ed   : >> { %v1050_v15 = vmax.f32 %v1048_v13, 0.0 }
 0x2ee   : >> { %2000 = vrsqrt.f32 %v1049_v14  ;;  %vm1053_vm4 = vcmp.eq.f32.partialorder %v1049_v14, inf  ;;  %v1056_v17 = vand.u32 2147483648, %v1049_v14  ;;  %vm1055_vm5 = vcmp.eq.f32.partialorder %v1049_v14, 0.0 }
 0x2ef   : >> { %2002 = vrsqrt.f32 %v1050_v15  ;;  %vm1060_vm6 = vcmp.eq.f32.partialorder %v1050_v15, inf  ;;  %v1063_v20 = vand.u32 2147483648, %v1050_v15  ;;  %vm1062_vm7 = vcmp.eq.f32.partialorder %v1050_v15, 0.0 }
 0x2f8   : >> { %v2001_v16 = vpop.eup %2000 }
 0x2f9   : >> { %v2003_v18 = vpop.eup %2002  ;;  %v1052_v19 = vmul.f32 %v2001_v16, %v1049_v14 }
 0x2fa   : >> { %v1059_v21 = vmul.f32 %v2003_v18, %v1050_v15 }
 0x2fb   : >> { %v1054_v22 = vsel %vm1053_vm4, %v1049_v14, %v1052_v19 }
 0x2fc   : >> { %v1057_v23 = vsel %vm1055_vm5, %v1056_v17, %v1054_v22  ;;  %v1061_v24 = vsel %vm1060_vm6, %v1050_v15, %v1059_v21 }
 0x2fd   : >> { %v1064_v25 = vsel %vm1062_vm7, %v1063_v20, %v1061_v24  ;;  %v1761_v26 = vadd.f32 -1.0, %v1057_v23 }
 0x2fe   : >> { %v1762_v27 = vadd.f32 -1.0, %v1064_v25 }
 0x2ff   : >> { %v1067_v28 = vadd.f32 %v1761_v26, %v1037_v2  ;;  %v1069_v29 = vmax.f32 %v2633_v3, %v1761_v26 }
 0x300   : >> { %v1068_v30 = vadd.f32 %v1762_v27, %v1038_v4  ;;  %v1070_v31 = vmax.f32 %v2635_v5, %v1762_v27 }
 0x301   : >> { %v1071_v32 = vmul.f32 %v1067_v28, %v2431_v43 }
 0x302   : >> { %v1072_v33 = vmul.f32 %v1068_v30, %v2435_v47 }
 0x303   : >> { %v1073_v34 = vadd.f32 %v1071_v32, %v2429_v42 }
 0x304   : >> { %v1074_v35 = vadd.f32 %v1072_v33, %v2433_v46 }
 0x305   : >> { %v1075_v36 = vmul.f32 %v1073_v34, %v1067_v28 }
 0x306   : >> { %v1076_v37 = vmul.f32 %v1074_v35, %v1068_v30 }
 0x307   : >> { %v1077_v38 = vadd.f32 %v1075_v36, %v2439_v50 }
 0x308   : >> { %v1078_v39 = vadd.f32 %v1076_v37, %v2442_v52 }
 0x309   : >> { %v1079_v40 = vmax.f32 %v1077_v38, 0.0 }
 0x30a   : >> { %v1080_v41 = vmax.f32 %v1078_v39, 0.0 }
 0x30b   : >> { %2004 = vrsqrt.f32 %v1079_v40  ;;  %vm1083_vm8 = vcmp.eq.f32.partialorder %v1079_v40, inf  ;;  %v1086_v45 = vand.u32 2147483648, %v1079_v40  ;;  %vm1085_vm9 = vcmp.eq.f32.partialorder %v1079_v40, 0.0 }
 0x30c   : >> { %2006 = vrsqrt.f32 %v1080_v41  ;;  %vm1090_vm10 = vcmp.eq.f32.partialorder %v1080_v41, inf  ;;  %v1093_v51 = vand.u32 2147483648, %v1080_v41  ;;  %vm1092_vm11 = vcmp.eq.f32.partialorder %v1080_v41, 0.0 }
 0x315   : >> { %v2005_v44 = vpop.eup %2004 }
 0x316   : >> { %v2007_v48 = vpop.eup %2006  ;;  %v1082_v49 = vmul.f32 %v2005_v44, %v1079_v40 }
 0x317   : >> { %v1089_v53 = vmul.f32 %v2007_v48, %v1080_v41 }
 0x318   : >> { %v1084_v54 = vsel %vm1083_vm8, %v1079_v40, %v1082_v49 }
 0x319   : >> { %v1087_v55 = vsel %vm1085_vm9, %v1086_v45, %v1084_v54  ;;  %v1091_v56 = vsel %vm1090_vm10, %v1080_v41, %v1089_v53 }
 0x31a   : >> { %v1094_v57 = vsel %vm1092_vm11, %v1093_v51, %v1091_v56  ;;  %v1763_v58 = vadd.f32 -1.0, %v1087_v55 }
 0x31b   : >> { %v1764_v59 = vadd.f32 -1.0, %v1094_v57 }
 0x31c   : >> { %v1097_v60 = vadd.f32 %v1763_v58, %v1067_v28  ;;  %v2651_v61 = vmax.f32 %v1069_v29, %v1763_v58 }
 0x31d   : >> { %v1098_v62 = vadd.f32 %v1764_v59, %v1068_v30  ;;  %v2653_v63 = vmax.f32 %v1070_v31, %v1764_v59 }
 0x31e   : >> { %v1101_v0 = vmul.f32 %v1097_v60, %v2431_v43 }
 0x31f   : >> { %v1102_v1 = vmul.f32 %v1098_v62, %v2435_v47 }
 0x320   : >> { %v1103_v2 = vadd.f32 %v1101_v0, %v2429_v42 }
 0x321   : >> { %v1104_v3 = vadd.f32 %v1102_v1, %v2433_v46 }
 0x322   : >> { %v1105_v4 = vmul.f32 %v1103_v2, %v1097_v60 }
 0x323   : >> { %v1106_v5 = vmul.f32 %v1104_v3, %v1098_v62 }
 0x324   : >> { %v1107_v6 = vadd.f32 %v1105_v4, %v2439_v50 }
 0x325   : >> { %v1108_v7 = vadd.f32 %v1106_v5, %v2442_v52 }
 0x326   : >> { %v1109_v8 = vmax.f32 %v1107_v6, 0.0 }
 0x327   : >> { %v1110_v9 = vmax.f32 %v1108_v7, 0.0 }
 0x328   : >> { %2008 = vrsqrt.f32 %v1109_v8  ;;  %vm1113_vm12 = vcmp.eq.f32.partialorder %v1109_v8, inf  ;;  %v1116_v11 = vand.u32 2147483648, %v1109_v8  ;;  %vm1115_vm13 = vcmp.eq.f32.partialorder %v1109_v8, 0.0 }
 0x329   : >> { %2010 = vrsqrt.f32 %v1110_v9  ;;  %vm1120_vm14 = vcmp.eq.f32.partialorder %v1110_v9, inf  ;;  %v1123_v14 = vand.u32 2147483648, %v1110_v9  ;;  %vm1122_vm15 = vcmp.eq.f32.partialorder %v1110_v9, 0.0 }
 0x332   : >> { %v2009_v10 = vpop.eup %2008 }
 0x333   : >> { %v2011_v12 = vpop.eup %2010  ;;  %v1112_v13 = vmul.f32 %v2009_v10, %v1109_v8 }
 0x334   : >> { %v1119_v15 = vmul.f32 %v2011_v12, %v1110_v9 }
 0x335   : >> { %v1114_v16 = vsel %vm1113_vm12, %v1109_v8, %v1112_v13 }
 0x336   : >> { %v1117_v17 = vsel %vm1115_vm13, %v1116_v11, %v1114_v16  ;;  %v1121_v18 = vsel %vm1120_vm14, %v1110_v9, %v1119_v15 }
 0x337   : >> { %v1124_v19 = vsel %vm1122_vm15, %v1123_v14, %v1121_v18  ;;  %v1765_v20 = vadd.f32 -1.0, %v1117_v17 }
 0x338   : >> { %v1766_v21 = vadd.f32 -1.0, %v1124_v19 }
 0x339   : >> { %v1127_v22 = vadd.f32 %v1765_v20, %v1097_v60  ;;  %v1129_v23 = vmax.f32 %v2651_v61, %v1765_v20 }
 0x33a   : >> { %v1128_v24 = vadd.f32 %v1766_v21, %v1098_v62  ;;  %v1130_v25 = vmax.f32 %v2653_v63, %v1766_v21 }
 0x33b   : >> { %v1131_v26 = vmul.f32 %v1127_v22, %v2431_v43 }
 0x33c   : >> { %v1132_v27 = vmul.f32 %v1128_v24, %v2435_v47 }
 0x33d   : >> { %v1133_v28 = vadd.f32 %v1131_v26, %v2429_v42 }
 0x33e   : >> { %v1134_v29 = vadd.f32 %v1132_v27, %v2433_v46 }
 0x33f   : >> { %v1135_v30 = vmul.f32 %v1133_v28, %v1127_v22 }
 0x340   : >> { %v1136_v31 = vmul.f32 %v1134_v29, %v1128_v24 }
 0x341   : >> { %v1137_v32 = vadd.f32 %v1135_v30, %v2439_v50 }
 0x342   : >> { %v1138_v33 = vadd.f32 %v1136_v31, %v2442_v52 }
 0x343   : >> { %v1139_v34 = vmax.f32 %v1137_v32, 0.0 }
 0x344   : >> { %v1140_v35 = vmax.f32 %v1138_v33, 0.0 }
 0x345   : >> { %2012 = vrsqrt.f32 %v1139_v34  ;;  %vm1143_vm0 = vcmp.eq.f32.partialorder %v1139_v34, inf  ;;  %v1146_v37 = vand.u32 2147483648, %v1139_v34  ;;  %vm1145_vm1 = vcmp.eq.f32.partialorder %v1139_v34, 0.0 }
 0x346   : >> { %2014 = vrsqrt.f32 %v1140_v35  ;;  %vm1150_vm2 = vcmp.eq.f32.partialorder %v1140_v35, inf  ;;  %v1153_v40 = vand.u32 2147483648, %v1140_v35  ;;  %vm1152_vm3 = vcmp.eq.f32.partialorder %v1140_v35, 0.0 }
 0x34f   : >> { %v2013_v36 = vpop.eup %2012 }
 0x350   : >> { %v2015_v38 = vpop.eup %2014  ;;  %v1142_v39 = vmul.f32 %v2013_v36, %v1139_v34 }
 0x351   : >> { %v1149_v41 = vmul.f32 %v2015_v38, %v1140_v35 }
 0x352   : >> { %v1144_v44 = vsel %vm1143_vm0, %v1139_v34, %v1142_v39 }
 0x353   : >> { %v1147_v45 = vsel %vm1145_vm1, %v1146_v37, %v1144_v44  ;;  %v1151_v48 = vsel %vm1150_vm2, %v1140_v35, %v1149_v41 }
 0x354   : >> { %v1154_v49 = vsel %vm1152_vm3, %v1153_v40, %v1151_v48  ;;  %v1767_v51 = vadd.f32 -1.0, %v1147_v45 }
 0x355   : >> { %v1768_v53 = vadd.f32 -1.0, %v1154_v49 }
 0x356   : >> { %v1157_v54 = vadd.f32 %v1767_v51, %v1127_v22  ;;  %v2669_v55 = vmax.f32 %v1129_v23, %v1767_v51 }
 0x357   : >> { %v1158_v56 = vadd.f32 %v1768_v53, %v1128_v24  ;;  %v2671_v57 = vmax.f32 %v1130_v25, %v1768_v53 }
 0x358   : >> { %v1161_v58 = vmul.f32 %v1157_v54, %v2431_v43 }
 0x359   : >> { %v1162_v59 = vmul.f32 %v1158_v56, %v2435_v47 }
 0x35a   : >> { %v1163_v60 = vadd.f32 %v1161_v58, %v2429_v42 }
 0x35b   : >> { %v1164_v61 = vadd.f32 %v1162_v59, %v2433_v46 }
 0x35c   : >> { %v1165_v62 = vmul.f32 %v1163_v60, %v1157_v54 }
 0x35d   : >> { %v1166_v63 = vmul.f32 %v1164_v61, %v1158_v56 }
 0x35e   : >> { %v1167_v0 = vadd.f32 %v1165_v62, %v2439_v50 }
 0x35f   : >> { %v1168_v1 = vadd.f32 %v1166_v63, %v2442_v52 }
 0x360   : >> { %v1169_v2 = vmax.f32 %v1167_v0, 0.0 }
 0x361   : >> { %v1170_v3 = vmax.f32 %v1168_v1, 0.0 }
 0x362   : >> { %2016 = vrsqrt.f32 %v1169_v2  ;;  %vm1173_vm4 = vcmp.eq.f32.partialorder %v1169_v2, inf  ;;  %v1176_v5 = vand.u32 2147483648, %v1169_v2  ;;  %vm1175_vm5 = vcmp.eq.f32.partialorder %v1169_v2, 0.0 }
 0x363   : >> { %2018 = vrsqrt.f32 %v1170_v3  ;;  %vm1180_vm6 = vcmp.eq.f32.partialorder %v1170_v3, inf  ;;  %v1183_v8 = vand.u32 2147483648, %v1170_v3  ;;  %vm1182_vm7 = vcmp.eq.f32.partialorder %v1170_v3, 0.0 }
 0x36c   : >> { %v2017_v4 = vpop.eup %2016 }
 0x36d   : >> { %v2019_v6 = vpop.eup %2018  ;;  %v1172_v7 = vmul.f32 %v2017_v4, %v1169_v2 }
 0x36e   : >> { %v1179_v9 = vmul.f32 %v2019_v6, %v1170_v3 }
 0x36f   : >> { %v1174_v10 = vsel %vm1173_vm4, %v1169_v2, %v1172_v7 }
 0x370   : >> { %v1177_v11 = vsel %vm1175_vm5, %v1176_v5, %v1174_v10  ;;  %v1181_v12 = vsel %vm1180_vm6, %v1170_v3, %v1179_v9 }
 0x371   : >> { %v1184_v13 = vsel %vm1182_vm7, %v1183_v8, %v1181_v12  ;;  %v1769_v14 = vadd.f32 -1.0, %v1177_v11 }
 0x372   : >> { %v1770_v15 = vadd.f32 -1.0, %v1184_v13 }
 0x373   : >> { %v1187_v16 = vadd.f32 %v1769_v14, %v1157_v54  ;;  %v1189_v17 = vmax.f32 %v2669_v55, %v1769_v14 }
 0x374   : >> { %v1188_v18 = vadd.f32 %v1770_v15, %v1158_v56  ;;  %v1190_v19 = vmax.f32 %v2671_v57, %v1770_v15 }
 0x375   : >> { %v1191_v20 = vmul.f32 %v1187_v16, %v2431_v43 }
 0x376   : >> { %v1192_v21 = vmul.f32 %v1188_v18, %v2435_v47 }
 0x377   : >> { %v1193_v22 = vadd.f32 %v1191_v20, %v2429_v42 }
 0x378   : >> { %v1194_v23 = vadd.f32 %v1192_v21, %v2433_v46 }
 0x379   : >> { %v1195_v24 = vmul.f32 %v1193_v22, %v1187_v16 }
 0x37a   : >> { %v1196_v25 = vmul.f32 %v1194_v23, %v1188_v18 }
 0x37b   : >> { %v1197_v26 = vadd.f32 %v1195_v24, %v2439_v50 }
 0x37c   : >> { %v1198_v27 = vadd.f32 %v1196_v25, %v2442_v52 }
 0x37d   : >> { %v1199_v28 = vmax.f32 %v1197_v26, 0.0 }
 0x37e   : >> { %v1200_v29 = vmax.f32 %v1198_v27, 0.0 }
 0x37f   : >> { %2020 = vrsqrt.f32 %v1199_v28  ;;  %vm1203_vm8 = vcmp.eq.f32.partialorder %v1199_v28, inf  ;;  %v1206_v31 = vand.u32 2147483648, %v1199_v28  ;;  %vm1205_vm9 = vcmp.eq.f32.partialorder %v1199_v28, 0.0 }
 0x380   : >> { %2022 = vrsqrt.f32 %v1200_v29  ;;  %vm1210_vm10 = vcmp.eq.f32.partialorder %v1200_v29, inf  ;;  %v1213_v34 = vand.u32 2147483648, %v1200_v29  ;;  %vm1212_vm11 = vcmp.eq.f32.partialorder %v1200_v29, 0.0 }
 0x389   : >> { %v2021_v30 = vpop.eup %2020 }
 0x38a   : >> { %v2023_v32 = vpop.eup %2022  ;;  %v1202_v33 = vmul.f32 %v2021_v30, %v1199_v28 }
 0x38b   : >> { %v1209_v35 = vmul.f32 %v2023_v32, %v1200_v29 }
 0x38c   : >> { %v1204_v36 = vsel %vm1203_vm8, %v1199_v28, %v1202_v33 }
 0x38d   : >> { %v1207_v37 = vsel %vm1205_vm9, %v1206_v31, %v1204_v36  ;;  %v1211_v38 = vsel %vm1210_vm10, %v1200_v29, %v1209_v35 }
 0x38e   : >> { %v1214_v39 = vsel %vm1212_vm11, %v1213_v34, %v1211_v38  ;;  %v1771_v40 = vadd.f32 -1.0, %v1207_v37 }
 0x38f   : >> { %v1772_v41 = vadd.f32 -1.0, %v1214_v39 }
 0x390   : >> { %v1217_v44 = vadd.f32 %v1771_v40, %v1187_v16  ;;  %v2687_v45 = vmax.f32 %v1189_v17, %v1771_v40 }
 0x391   : >> { %v1218_v48 = vadd.f32 %v1772_v41, %v1188_v18  ;;  %v2689_v49 = vmax.f32 %v1190_v19, %v1772_v41 }
 0x392   : >> { %v1221_v51 = vmul.f32 %v1217_v44, %v2431_v43 }
 0x393   : >> { %v1222_v53 = vmul.f32 %v1218_v48, %v2435_v47 }
 0x394   : >> { %v1223_v54 = vadd.f32 %v1221_v51, %v2429_v42 }
 0x395   : >> { %v1224_v55 = vadd.f32 %v1222_v53, %v2433_v46 }
 0x396   : >> { %v1225_v56 = vmul.f32 %v1223_v54, %v1217_v44 }
 0x397   : >> { %v1226_v57 = vmul.f32 %v1224_v55, %v1218_v48 }
 0x398   : >> { %v1227_v58 = vadd.f32 %v1225_v56, %v2439_v50 }
 0x399   : >> { %v1228_v59 = vadd.f32 %v1226_v57, %v2442_v52 }
 0x39a   : >> { %v1229_v60 = vmax.f32 %v1227_v58, 0.0 }
 0x39b   : >> { %v1230_v61 = vmax.f32 %v1228_v59, 0.0 }
 0x39c   : >> { %2024 = vrsqrt.f32 %v1229_v60  ;;  %vm1233_vm12 = vcmp.eq.f32.partialorder %v1229_v60, inf  ;;  %v1236_v63 = vand.u32 2147483648, %v1229_v60  ;;  %vm1235_vm13 = vcmp.eq.f32.partialorder %v1229_v60, 0.0 }
 0x39d   : >> { %2026 = vrsqrt.f32 %v1230_v61  ;;  %vm1240_vm14 = vcmp.eq.f32.partialorder %v1230_v61, inf  ;;  %v1243_v2 = vand.u32 2147483648, %v1230_v61  ;;  %vm1242_vm15 = vcmp.eq.f32.partialorder %v1230_v61, 0.0 }
 0x3a6   : >> { %v2025_v62 = vpop.eup %2024 }
 0x3a7   : >> { %v2027_v0 = vpop.eup %2026  ;;  %v1232_v1 = vmul.f32 %v2025_v62, %v1229_v60 }
 0x3a8   : >> { %v1239_v3 = vmul.f32 %v2027_v0, %v1230_v61 }
 0x3a9   : >> { %v1234_v4 = vsel %vm1233_vm12, %v1229_v60, %v1232_v1 }
 0x3aa   : >> { %v1237_v5 = vsel %vm1235_vm13, %v1236_v63, %v1234_v4  ;;  %v1241_v6 = vsel %vm1240_vm14, %v1230_v61, %v1239_v3 }
 0x3ab   : >> { %v1244_v7 = vsel %vm1242_vm15, %v1243_v2, %v1241_v6  ;;  %v1773_v8 = vadd.f32 -1.0, %v1237_v5 }
 0x3ac   : >> { %v1774_v9 = vadd.f32 -1.0, %v1244_v7 }
 0x3ad   : >> { %v1247_v10 = vadd.f32 %v1773_v8, %v1217_v44  ;;  %v1249_v11 = vmax.f32 %v2687_v45, %v1773_v8 }
 0x3ae   : >> { %v1248_v12 = vadd.f32 %v1774_v9, %v1218_v48  ;;  %v1250_v13 = vmax.f32 %v2689_v49, %v1774_v9 }
 0x3af   : >> { %v1251_v14 = vmul.f32 %v1247_v10, %v2431_v43 }
 0x3b0   : >> { %v1252_v15 = vmul.f32 %v1248_v12, %v2435_v47 }
 0x3b1   : >> { %v1253_v16 = vadd.f32 %v1251_v14, %v2429_v42 }
 0x3b2   : >> { %v1254_v17 = vadd.f32 %v1252_v15, %v2433_v46 }
 0x3b3   : >> { %v1255_v18 = vmul.f32 %v1253_v16, %v1247_v10 }
 0x3b4   : >> { %v1256_v19 = vmul.f32 %v1254_v17, %v1248_v12 }
 0x3b5   : >> { %v1257_v20 = vadd.f32 %v1255_v18, %v2439_v50 }
 0x3b6   : >> { %v1258_v21 = vadd.f32 %v1256_v19, %v2442_v52 }
 0x3b7   : >> { %v1259_v22 = vmax.f32 %v1257_v20, 0.0 }
 0x3b8   : >> { %v1260_v23 = vmax.f32 %v1258_v21, 0.0 }
 0x3b9   : >> { %2028 = vrsqrt.f32 %v1259_v22  ;;  %vm1263_vm0 = vcmp.eq.f32.partialorder %v1259_v22, inf  ;;  %v1266_v25 = vand.u32 2147483648, %v1259_v22  ;;  %vm1265_vm1 = vcmp.eq.f32.partialorder %v1259_v22, 0.0 }
 0x3ba   : >> { %2030 = vrsqrt.f32 %v1260_v23  ;;  %vm1270_vm2 = vcmp.eq.f32.partialorder %v1260_v23, inf  ;;  %v1273_v28 = vand.u32 2147483648, %v1260_v23  ;;  %vm1272_vm3 = vcmp.eq.f32.partialorder %v1260_v23, 0.0 }
 0x3c3   : >> { %v2029_v24 = vpop.eup %2028 }
 0x3c4   : >> { %v2031_v26 = vpop.eup %2030  ;;  %v1262_v27 = vmul.f32 %v2029_v24, %v1259_v22 }
 0x3c5   : >> { %v1269_v29 = vmul.f32 %v2031_v26, %v1260_v23 }
 0x3c6   : >> { %v1264_v30 = vsel %vm1263_vm0, %v1259_v22, %v1262_v27 }
 0x3c7   : >> { %v1267_v31 = vsel %vm1265_vm1, %v1266_v25, %v1264_v30  ;;  %v1271_v32 = vsel %vm1270_vm2, %v1260_v23, %v1269_v29 }
 0x3c8   : >> { %v1274_v33 = vsel %vm1272_vm3, %v1273_v28, %v1271_v32  ;;  %v1775_v34 = vadd.f32 -1.0, %v1267_v31 }
 0x3c9   : >> { %v1776_v35 = vadd.f32 -1.0, %v1274_v33 }
 0x3ca   : >> { %v1277_v36 = vadd.f32 %v1775_v34, %v1247_v10  ;;  %v2705_v37 = vmax.f32 %v1249_v11, %v1775_v34 }
 0x3cb   : >> { %v1278_v38 = vadd.f32 %v1776_v35, %v1248_v12  ;;  %v2707_v39 = vmax.f32 %v1250_v13, %v1776_v35 }
 0x3cc   : >> { %v1281_v40 = vmul.f32 %v1277_v36, %v2431_v43 }
 0x3cd   : >> { %v1282_v41 = vmul.f32 %v1278_v38, %v2435_v47 }
 0x3ce   : >> { %v1283_v44 = vadd.f32 %v1281_v40, %v2429_v42 }
 0x3cf   : >> { %v1284_v45 = vadd.f32 %v1282_v41, %v2433_v46 }
 0x3d0   : >> { %v1285_v48 = vmul.f32 %v1283_v44, %v1277_v36 }
 0x3d1   : >> { %v1286_v49 = vmul.f32 %v1284_v45, %v1278_v38 }
 0x3d2   : >> { %v1287_v51 = vadd.f32 %v1285_v48, %v2439_v50 }
 0x3d3   : >> { %v1288_v53 = vadd.f32 %v1286_v49, %v2442_v52 }
 0x3d4   : >> { %v1289_v54 = vmax.f32 %v1287_v51, 0.0 }
 0x3d5   : >> { %v1290_v55 = vmax.f32 %v1288_v53, 0.0 }
 0x3d6   : >> { %2032 = vrsqrt.f32 %v1289_v54  ;;  %vm1293_vm4 = vcmp.eq.f32.partialorder %v1289_v54, inf  ;;  %v1296_v57 = vand.u32 2147483648, %v1289_v54  ;;  %vm1295_vm5 = vcmp.eq.f32.partialorder %v1289_v54, 0.0 }
 0x3d7   : >> { %2034 = vrsqrt.f32 %v1290_v55  ;;  %vm1300_vm6 = vcmp.eq.f32.partialorder %v1290_v55, inf  ;;  %v1303_v60 = vand.u32 2147483648, %v1290_v55  ;;  %vm1302_vm7 = vcmp.eq.f32.partialorder %v1290_v55, 0.0 }
 0x3e0   : >> { %v2033_v56 = vpop.eup %2032 }
 0x3e1   : >> { %v2035_v58 = vpop.eup %2034  ;;  %v1292_v59 = vmul.f32 %v2033_v56, %v1289_v54  ;;  %v1385_v56 = vstv %s2374_s20 }
 0x3e2   : >> { %v1299_v61 = vmul.f32 %v2035_v58, %v1290_v55  ;;  %v1388_v58 = vstv %s2380_s9 }
 0x3e3   : >> { %v1294_v62 = vsel %vm1293_vm4, %v1289_v54, %v1292_v59  ;;  %v1413_v59 = vstv %s2376_s13 }
 0x3e4   : >> { %v1297_v63 = vsel %vm1295_vm5, %v1296_v57, %v1294_v62  ;;  %v1301_v0 = vsel %vm1300_vm6, %v1290_v55, %v1299_v61  ;;  %v1393_v62 = vstv %s2386_s8 }
 0x3e5   : >> { %v1304_v1 = vsel %vm1302_vm7, %v1303_v60, %v1301_v0  ;;  %v1777_v2 = vadd.f32 -1.0, %v1297_v63  ;;  %v1416_v60 = vstv %s2382_s6  ;;  %v1441_v63 = vstv %s2378_s26 }
 0x3e6   : >> { %v1778_v3 = vadd.f32 -1.0, %v1304_v1  ;;  %v1444_v0 = vstv %s2384_s0  ;;  %v2068_v1 = vld [vmem:[%s2415_s10] sm:$0xff] }
 0x3e7   : >> { %v1307_v4 = vadd.f32 %v1777_v2, %v1277_v36  ;;  %v1309_v5 = vmax.f32 %v2705_v37, %v1777_v2 }
 0x3e8   : >> { %v1308_v6 = vadd.f32 %v1778_v3, %v1278_v38  ;;  %v1310_v7 = vmax.f32 %v2707_v39, %v1778_v3  ;;  %v2069_v3 = vld [vmem:[%s2415_s10 + $0x20] sm:$0xff] }
 0x3e9   : >> { %v1311_v8 = vmul.f32 %v1307_v4, %v2431_v43 }
 0x3ea   : >> { %v1312_v9 = vmul.f32 %v1308_v6, %v2435_v47 }
 0x3eb   : >> { %v1313_v10 = vadd.f32 %v1311_v8, %v2429_v42  ;;  %v2071_v8 = vld [vmem:[%s2415_s10 + $0x8] sm:$0xff] }
 0x3ec   : >> { %v1314_v11 = vadd.f32 %v1312_v9, %v2433_v46 }
 0x3ed   : >> { %v1315_v12 = vmul.f32 %v1313_v10, %v1307_v4  ;;  %v2072_v10 = vld [vmem:[%s2415_s10 + $0x28] sm:$0xff] }
 0x3ee   : >> { %v1316_v13 = vmul.f32 %v1314_v11, %v1308_v6 }
 0x3ef   : >> { %v1317_v14 = vadd.f32 %v1315_v12, %v2439_v50  ;;  %v2073_v12 = vld [vmem:[%s2415_s10 + $0x48] sm:$0xff] }
 0x3f0   : >> { %v1318_v15 = vadd.f32 %v1316_v13, %v2442_v52 }
 0x3f1   : >> { %v1319_v16 = vmax.f32 %v1317_v14, 0.0  ;;  %v1398_v14 = vstv %s2392_s23 }
 0x3f2   : >> { %v1320_v17 = vmax.f32 %v1318_v15, 0.0  ;;  %v2074_v15 = vld [vmem:[%s2410_s29] sm:$0xff] }
 0x3f3   : >> { %2036 = vrsqrt.f32 %v1319_v16  ;;  %vm1323_vm8 = vcmp.eq.f32.partialorder %v1319_v16, inf  ;;  %v1326_v19 = vand.u32 2147483648, %v1319_v16  ;;  %vm1325_vm9 = vcmp.eq.f32.partialorder %v1319_v16, 0.0 }
 0x3f4   : >> { %2038 = vrsqrt.f32 %v1320_v17  ;;  %vm1330_vm10 = vcmp.eq.f32.partialorder %v1320_v17, inf  ;;  %v1333_v22 = vand.u32 2147483648, %v1320_v17  ;;  %vm1332_vm11 = vcmp.eq.f32.partialorder %v1320_v17, 0.0 }
 0x3fd   : >> { %v2037_v18 = vpop.eup %2036 }
 0x3fe   : >> { %v2039_v20 = vpop.eup %2038  ;;  %v1322_v21 = vmul.f32 %v2037_v18, %v1319_v16 }
 0x3ff   : >> { %v1329_v23 = vmul.f32 %v2039_v20, %v1320_v17 }
 0x400   : >> { %v1324_v24 = vsel %vm1323_vm8, %v1319_v16, %v1322_v21  ;;  %v1449_v21 = vstv %s2390_s22 }
 0x401   : >> { %v1327_v25 = vsel %vm1325_vm9, %v1326_v19, %v1324_v24  ;;  %v1331_v26 = vsel %vm1330_vm10, %v1320_v17, %v1329_v23  ;;  %v2075_v17 = vld [vmem:[%s2410_s29 + $0x20] sm:$0xff]  ;;  %v2078_v24 = vld [vmem:[%s2410_s29 + $0x28] sm:$0xff] }
 0x402   : >> { %v1334_v27 = vsel %vm1332_vm11, %v1333_v22, %v1331_v26  ;;  %v1779_v28 = vadd.f32 -1.0, %v1327_v25  ;;  %v2076_v19 = vld [vmem:[%s2410_s29 + $0x40] sm:$0xff]  ;;  %v2077_v22 = vld [vmem:[%s2410_s29 + $0x8] sm:$0xff] }
 0x403   : >> { %v1780_v29 = vadd.f32 -1.0, %v1334_v27  ;;  %v2079_v26 = vld [vmem:[%s2410_s29 + $0x48] sm:$0xff]  ;;  %s1471_s29 = scalar_lea.vmem %s2870_s1, %s2405_s25 [#allocation11] }
 0x404   : >> { %v1337_v30 = vadd.f32 %v1779_v28, %v1307_v4  ;;  %v2723_v31 = vmax.f32 %v1309_v5, %v1779_v28  ;;  %v2070_v5 = vld [vmem:[%s2415_s10 + $0x40] sm:$0xff]  ;;  %v1426_v28 = vstv %s2394_s5  ;;  %s1485_s10 = scalar_lea.sflag (%p350_p8), [#allocation4], %s2349_s2 }
 0x405   : >> { %v1338_v32 = vadd.f32 %v1780_v29, %v1308_v6  ;;  %v2725_v33 = vmax.f32 %v1310_v7, %v1780_v29  ;;  %v1421_v7 = vstv %s2388_s11 }
 0x406   : >> { %v1341_v34 = vmul.f32 %v1337_v30, %v2431_v43 }
 0x407   : >> { %v1342_v35 = vmul.f32 %v1338_v32, %v2435_v47 }
 0x408   : >> { %v1343_v36 = vadd.f32 %v1341_v34, %v2429_v42 }
 0x409   : >> { %v1344_v37 = vadd.f32 %v1342_v35, %v2433_v46 }
 0x40a   : >> { %v1345_v38 = vmul.f32 %v1343_v36, %v1337_v30 }
 0x40b   : >> { %v1346_v39 = vmul.f32 %v1344_v37, %v1338_v32 }
 0x40c   : >> { %v1347_v40 = vadd.f32 %v1345_v38, %v2439_v50 }
 0x40d   : >> { %v1348_v41 = vadd.f32 %v1346_v39, %v2442_v52 }
 0x40e   : >> { %v1349_v44 = vmax.f32 %v1347_v40, 0.0 }
 0x40f   : >> { %v1350_v45 = vmax.f32 %v1348_v41, 0.0 }
 0x410   : >> { %2040 = vrsqrt.f32 %v1349_v44  ;;  %vm1353_vm12 = vcmp.eq.f32.partialorder %v1349_v44, inf  ;;  %v1356_v43 = vand.u32 2147483648, %v1349_v44  ;;  %vm1355_vm13 = vcmp.eq.f32.partialorder %v1349_v44, 0.0 }
 0x411   : >> { %2042 = vrsqrt.f32 %v1350_v45  ;;  %vm1360_vm14 = vcmp.eq.f32.partialorder %v1350_v45, inf  ;;  %v1363_v46 = vand.u32 2147483648, %v1350_v45  ;;  %vm1362_vm15 = vcmp.eq.f32.partialorder %v1350_v45, 0.0 }
 0x41a   : >> { %v2041_v48 = vpop.eup %2040 }
 0x41b   : >> { %v2043_v47 = vpop.eup %2042  ;;  %v1352_v42 = vmul.f32 %v2041_v48, %v1349_v44 }
 0x41c   : >> { %v1359_v50 = vmul.f32 %v2043_v47, %v1350_v45 }
 0x41d   : >> { %v1354_v52 = vsel %vm1353_vm12, %v1349_v44, %v1352_v42 }
 0x41e   : >> { %v1357_v49 = vsel %vm1355_vm13, %v1356_v43, %v1354_v52  ;;  %v1361_v51 = vsel %vm1360_vm14, %v1350_v45, %v1359_v50 }
 0x41f   : >> { %v1364_v53 = vsel %vm1362_vm15, %v1363_v46, %v1361_v51  ;;  %v2733_v54 = vadd.f32 -1.0, %v1357_v49 }
 0x420   : >> { %v2735_v55 = vadd.f32 -1.0, %v1364_v53 }
 0x421   : >> { %v1367_v57 = vadd.f32 %v2733_v54, %v1337_v30 }
 0x422   : >> { %v1368_v61 = vadd.f32 %v2735_v55, %v1338_v32 }
 0x423   : >> { %v1373_v2 = vmul.f32 %v2068_v1, %v1367_v57  ;;  %v1377_v4 = vmul.f32 %v2069_v3, %v1367_v57  ;;  %v1381_v6 = vmul.f32 %v2070_v5, %v1367_v57  ;;  %v1454_v1 = vstv %s2396_s7 }
 0x424   : >> { %v1374_v9 = vmul.f32 %v2071_v8, %v1368_v61  ;;  %v1378_v11 = vmul.f32 %v2072_v10, %v1368_v61  ;;  %v1382_v13 = vmul.f32 %v2073_v12, %v1368_v61 }
 0x425   : >> { %v1375_v16 = vadd.f32 %v2074_v15, %v1373_v2  ;;  %v1379_v18 = vadd.f32 %v2075_v17, %v1377_v4  ;;  %v1383_v20 = vadd.f32 %v2076_v19, %v1381_v6 }
 0x426   : >> { %v1376_v23 = vadd.f32 %v2077_v22, %v1374_v9  ;;  %v1380_v25 = vadd.f32 %v2078_v24, %v1378_v11  ;;  %v1384_v27 = vadd.f32 %v2079_v26, %v1382_v13  ;;  %v1369_v24 = vmax.f32 %v2723_v31, %v2733_v54 }
 0x427   : >> { %v1386_v29 = vmul.f32 %v1385_v56, %v1375_v16  ;;  %v1389_v30 = vmul.f32 %v1388_v58, %v1379_v18  ;;  %v1394_v32 = vmul.f32 %v1393_v62, %v1383_v20  ;;  %v1414_v34 = vmul.f32 %v1413_v59, %v1375_v16 }
 0x428   : >> { %v1387_v35 = vmul.f32 %v1385_v56, %v1376_v23  ;;  %v1390_v36 = vmul.f32 %v1388_v58, %v1380_v25  ;;  %v1395_v37 = vmul.f32 %v1393_v62, %v1384_v27  ;;  %v1415_v38 = vmul.f32 %v1413_v59, %v1376_v23 }
 0x429   : >> { %v1391_v39 = vadd.f32 %v1389_v30, %v1386_v29  ;;  %v1417_v40 = vmul.f32 %v1416_v60, %v1379_v18  ;;  %v1418_v41 = vmul.f32 %v1416_v60, %v1380_v25  ;;  %v1422_v44 = vmul.f32 %v1421_v7, %v1383_v20 }
 0x42a   : >> { %v1392_v45 = vadd.f32 %v1390_v36, %v1387_v35  ;;  %v1423_v48 = vmul.f32 %v1421_v7, %v1384_v27  ;;  %v1442_v43 = vmul.f32 %v1441_v63, %v1375_v16  ;;  %v1443_v47 = vmul.f32 %v1441_v63, %v1376_v23 }
 0x42b   : >> { %v1396_v42 = vadd.f32 %v1394_v32, %v1391_v39  ;;  %v1419_v46 = vadd.f32 %v1417_v40, %v1414_v34  ;;  %v1420_v50 = vadd.f32 %v1418_v41, %v1415_v38  ;;  %v1445_v52 = vmul.f32 %v1444_v0, %v1379_v18 }
 0x42c   : >> { %v1397_v49 = vadd.f32 %v1395_v37, %v1392_v45  ;;  %v1446_v51 = vmul.f32 %v1444_v0, %v1380_v25  ;;  %v1450_v53 = vmul.f32 %v1449_v21, %v1383_v20  ;;  %v1451_v56 = vmul.f32 %v1449_v21, %v1384_v27 }
 0x42d   : >> { %v1399_v57 = vadd.f32 %v1398_v14, %v1396_v42  ;;  %v1424_v58 = vadd.f32 %v1422_v44, %v1419_v46  ;;  %v1425_v59 = vadd.f32 %v1423_v48, %v1420_v50  ;;  %v1447_v61 = vadd.f32 %v1445_v52, %v1442_v43 }
 0x42e   : >> { %v1400_v62 = vadd.f32 %v1398_v14, %v1397_v49  ;;  %v1448_v60 = vadd.f32 %v1446_v51, %v1443_v47  ;;  %v1370_v25 = vmax.f32 %v2725_v33, %v2735_v55  ;;  %vm2767_vm0 = vcmp.lt.f32.partialorder %v1369_v24, 10.0 }
 0x42f   : >> { %v1783_v2 = vmul.f32 -1.442695, %v1399_v57  ;;  %v1427_v3 = vadd.f32 %v1426_v28, %v1424_v58  ;;  %v1428_v4 = vadd.f32 %v1426_v28, %v1425_v59  ;;  %v1452_v5 = vadd.f32 %v1450_v53, %v1447_v61 }
 0x430   : >> { %v1784_v63 = vmul.f32 -1.442695, %v1400_v62  ;;  %v1453_v6 = vadd.f32 %v1451_v56, %v1448_v60  ;;  %vm2771_vm1 = vcmp.lt.f32.partialorder %v1370_v25, 10.0 }
 0x431   : >> { %2044 = vpow2.f32 %v1783_v2  ;;  %v1785_v7 = vmul.f32 -1.442695, %v1427_v3  ;;  %v1786_v8 = vmul.f32 -1.442695, %v1428_v4  ;;  %v1455_v9 = vadd.f32 %v1454_v1, %v1452_v5 }
 0x432   : >> { %2046 = vpow2.f32 %v1784_v63  ;;  %v1456_v0 = vadd.f32 %v1454_v1, %v1453_v6 }
 0x433   : >> { %2048 = vpow2.f32 %v1785_v7  ;;  %v1787_v10 = vmul.f32 -1.442695, %v1455_v9 }
 0x434   : >> { %2050 = vpow2.f32 %v1786_v8  ;;  %v1788_v11 = vmul.f32 -1.442695, %v1456_v0 }
 0x435   : >> { %2052 = vpow2.f32 %v1787_v10 }
 0x436   : >> { %2054 = vpow2.f32 %v1788_v11 }
 0x43b   : >> { %v2045_v12 = vpop.eup %2044 }
 0x43c   : >> { %v2047_v13 = vpop.eup %2046  ;;  %v1407_v14 = vadd.f32 1.0, %v2045_v12 }
 0x43d   : >> { %v2049_v15 = vpop.eup %2048  ;;  %v1408_v16 = vadd.f32 1.0, %v2047_v13 }
 0x43e   : >> { %v2051_v17 = vpop.eup %2050  ;;  %2056 = vrcp.f32 %v1407_v14  ;;  %v1435_v18 = vadd.f32 1.0, %v2049_v15 }
 0x43f   : >> { %v2053_v19 = vpop.eup %2052  ;;  %2058 = vrcp.f32 %v1408_v16  ;;  %v1436_v20 = vadd.f32 1.0, %v2051_v17 }
 0x440   : >> { %v2055_v21 = vpop.eup %2054  ;;  %2060 = vrcp.f32 %v1435_v18  ;;  %v1463_v22 = vadd.f32 1.0, %v2053_v19 }
 0x441   : >> { %2062 = vrcp.f32 %v1436_v20  ;;  %v1464_v23 = vadd.f32 1.0, %v2055_v21 }
 0x442   : >> { %2064 = vrcp.f32 %v1463_v22 }
 0x443   : >> { %2066 = vrcp.f32 %v1464_v23 }
 0x448   : >> { %v2057_v28 = vpop.eup %2056 }
 0x449   : >> { %v2059_v29 = vpop.eup %2058  ;;  %v1469_v31 = vsel %vm2767_vm0, %v2057_v28, 0.0  ;;  %352 = sbr.rel (!%p350_p8) target bundleno = 120 (0x78), region = 134 }
 0x44a   : >> { %v2061_v54 = vpop.eup %2060  ;;  %v1470_v33 = vsel %vm2771_vm1, %v2059_v29, 0.0  ;;  %1472 = vst [vmem:[%s1471_s29] sm:$0xff] %v1469_v31 }
 0x44b   : >> { %v2063_v55 = vpop.eup %2062  ;;  %1473 = vst [vmem:[%s1471_s29 + $0x8] sm:$0xff] %v1470_v33  ;;  %v1474_v30 = vsel %vm2767_vm0, %v2061_v54, 0.0 }
 0x44c   : >> { %v2065_v32 = vpop.eup %2064  ;;  %v1475_v34 = vsel %vm2771_vm1, %v2063_v55, 0.0  ;;  %1790 = vst [vmem:[%s1471_s29 + $0x20] sm:$0xff] %v1474_v30 }
 0x44d   : >> { %v2067_v35 = vpop.eup %2066  ;;  %1791 = vst [vmem:[%s1471_s29 + $0x28] sm:$0xff] %v1475_v34  ;;  %v1479_v36 = vsel %vm2767_vm0, %v2065_v32, 0.0 }
 0x44e   : >> { %v1480_v37 = vsel %vm2771_vm1, %v2067_v35, 0.0  ;;  %1793 = vst [vmem:[%s1471_s29 + $0x40] sm:$0xff] %v1479_v36 }
 0x44f   : >> { %1794 = vst [vmem:[%s1471_s29 + $0x48] sm:$0xff] %v1480_v37 }
 0x450   : > { %s1801_s25 = sshll.u32 %s2237_s19, 9  ;;  %s2871_s1 = scalar_lea.vmem [#allocation11], %s2352_s12 }
 0x451   : > { %s1514_s3 = sshll.u32 %s2871_s1, 4  ;;  %s1497_s17 = scalar_lea.hbm %s2835_s4, %s1801_s25  ;;  %s1515_s3 = int_to_ptr.vmem [resolvable:$true] %s1514_s3 }
 0x452   : > { %s2184_s14 = smov 512   ;;  %p2872_p9 = scmp.ne.s32.totalorder %s2850_s27, 0 }
 0x453   : > { %s2185_s2 = smov 2048   ;;  %s2186_s30 = smov 4  }
 0x454   : > { %1831 = sst [smem:[#allocation17]] (%p2872_p9), %s2184_s14  ;;  %s2187_s20 = smov 128  }
 0x455   : > { %1832 = sst [smem:[#allocation17 + $0x1]] (%p2872_p9), %s2185_s2  ;;  %s2188_s19 = smov 8  }
 0x456   : > { %1833 = sst [smem:[#allocation17 + $0x2]] (%p2872_p9), %s2186_s30  ;;  %s2189_s24 = smov [#allocation16]  }
 0x457   : > { %1834 = sst [smem:[#allocation17 + $0x3]] (%p2872_p9), %s2187_s20  ;;  %s2190_s12 = smov 0  }
 0x458   : > { %1835 = sst [smem:[#allocation17 + $0x4]] (%p2872_p9), %s2187_s20 }
 0x459   : > { %1836 = sst [smem:[#allocation17 + $0x5]] (%p2872_p9), %s2188_s19 }
 0x45a   : > { %1837 = dma.general (%p2872_p9), %s1515_s3, 1536, %s1497_s17, %s1485_s10, %s2189_s24, [#allocation17], %s2190_s12, 0  }
 0x45b PF: > { %p1854_p10 = scmp.ge.s32.totalorder %s2164_s18, 2  ;;  %s1542_s13 = sand.u32 1, %s2152_s15  }
 0x45c   : > { %p2873_p1 = scmp.ne.s32.totalorder %s2851_s28, 0  ;;  %s1543_s26 = scalar_lea.sflag [#allocation4], %s1542_s13 }
 0x45e   : > { %p1847_p2 = pnand %p1854_p10, %p2873_p1 }
 0x460   : > { %2147 = dma.done.wait (!%p1847_p2), %s1543_s26, 1536  }
 0x461   : > { %2149 = vsyncadd (!%p1847_p2), %s1543_s26, 4294965760  ;;  %s2874_s9 = sld [smem:[#allocation25_spill]]  ;;  %s2875_s17 = sld [smem:[#allocation26_spill]] }
 0x462   : > { %p22_p7 = scmp.ge.s32.totalorder %s2241_s21, 6   ;;  %s2876_s15 = smov %s2156_s16 }
 0x463   : > { %s2878_s18 = smov %s2241_s21 }
 0x464   :  { %24 = sbr.rel (!%p22_p7) target bundleno = 14 (0xe), region = 145 }
 0x467   : > { %s2877_s16 = smov %s2874_s9 }
 0x46b   :  { %1548 = vsyncpa [#allocation3], 1 }
 0x46c   :  { %1550 = vsyncpa [#allocation3 + $0x1], 1 }
 0x46d   :  { %1551 = vsyncpa [#allocation7], 1 }
 0x46e   :  { %1553 = vsyncpa [#allocation7 + $0x1], 1 }
 0x46f   :  { %1554 = vsyncpa [#allocation4], 1 }
 0x470   :  { %1556 = vsyncpa [#allocation4 + $0x1], 1 }
 0x471   :  { %1557 = vsyncpa [#allocation5], 1 }
 0x472   :  { %1559 = vsyncpa [#allocation5 + $0x1], 1 }
 0x473   :  { %1560 = vsyncpa [#allocation10], 1 }

</bundles_post_ra>
